<compile_context>
chip_gen: v6e
topology: v6e:2x2x1
jax: 0.10.0
libtpu: 0.0.40
codegen_flags: <defaults>
</compile_context>

<pallas_src>
import functools

import jax
import jax.numpy as jnp
from jax.experimental import pallas as pl
from jax.experimental.pallas import tpu as pltpu

IN_SIZE = 128
INTER_SIZE = 96
OUT_SIZE = 64
PAD = 128               # all padded feature dims are a full lane width
NEG_SLOPE = 0.01        # PyTorch F.leaky_relu default


def _leaky_relu(x):
    # slope < 1  =>  max(x, slope*x) == leaky_relu(x); 2 VPU ops (mul+max).
    return jnp.maximum(x, NEG_SLOPE * x)


def autoencoder_kernel(x_ref,
                       w1_ref, b1_ref,
                       w2_ref, b2_ref,
                       w3_ref, b3_ref,
                       w4_ref, b4_ref,
                       a_ref, y_ref):
    cdt = w1_ref.dtype                 # bf16 (fast path) or f32 (exact path)
    x = x_ref[...].astype(cdt)

    # L1 + leaky_relu  (128 -> 128[96 real]; pad cols of W1/b1 are zero)
    h1 = jnp.dot(x, w1_ref[...], preferred_element_type=jnp.float32) + b1_ref[...]
    h1 = _leaky_relu(h1)

    # L2 + sigmoid (tanh form: one EUP op, no divide)  -> bottleneck "a"
    z2 = jnp.dot(h1.astype(cdt), w2_ref[...], preferred_element_type=jnp.float32) + b2_ref[...]
    a = 0.5 * jnp.tanh(0.5 * z2) + 0.5
    a_ref[...] = a[:, :OUT_SIZE].astype(a_ref.dtype)   # real 64-wide output

    # L3 + leaky_relu (rows 64..127 of W3 are zero -> a's 0.5-valued pad columns are ignored)
    h3 = jnp.dot(a.astype(cdt), w3_ref[...], preferred_element_type=jnp.float32) + b3_ref[...]
    h3 = _leaky_relu(h3)

    # L4 + tanh (rows 96..127 of W4 are zero -> h3's zero pad columns are ignored)
    z4 = jnp.dot(h3.astype(cdt), w4_ref[...], preferred_element_type=jnp.float32) + b4_ref[...]
    y_ref[...] = jnp.tanh(z4).astype(y_ref.dtype)


def _pad2(w, rows, cols):
    r, c = w.shape
    return jnp.pad(w, ((0, rows - r), (0, cols - c)))


def prepare_params(params, mxu_bf16=True):
    """One-time prep (call outside the hot path): zero-pad every matmul to 128x128
    and optionally pre-cast weights to bf16 for the MXU. Biases stay f32 (added
    after the f32 accumulation)."""
    wdt = jnp.bfloat16 if mxu_bf16 else jnp.float32
    pw = lambda w: _pad2(w, PAD, PAD).astype(wdt)
    pb = lambda b: _pad2(b, 1, PAD).astype(jnp.float32)
    return {"w1": pw(params["w1"]), "b1": pb(params["b1"]),
            "w2": pw(params["w2"]), "b2": pb(params["b2"]),
            "w3": pw(params["w3"]), "b3": pb(params["b3"]),
            "w4": pw(params["w4"]), "b4": pb(params["b4"])}


def _choose_block_b(batch, requested):
    """Largest batch tile that (a) is a multiple of 8 (or the whole batch) and
    (b) leaves >= 2 grid steps when the batch allows, so v7x's two TensorCores
    both get work from the 'parallel' axis."""
    requested = 1024 if requested is None else requested
    if batch <= 8:
        return batch                      # single block equal to the full dim
    if batch < 16:
        return 8
    half = max(8, (pl.cdiv(batch, 2) // 8) * 8)
    bb = min(requested, half)
    return max(8, (bb // 8) * 8)


@functools.partial(jax.jit, static_argnames=("block_b",))
def autoencoder_forward(x, params, block_b=None):
    """x: (B, IN_SIZE) float32. params: output of prepare_params()."""
    B = x.shape[0]
    block_b = _choose_block_b(B, block_b)
    grid = (pl.cdiv(B, block_b),)         # ragged final block handled by Pallas

    const2d = lambda shape: pl.BlockSpec(shape, lambda i: (0, 0))  # loop-invariant

    grid_spec = pltpu.PrefetchScalarGridSpec(
        num_scalar_prefetch=0,
        grid=grid,
        in_specs=[
            pl.BlockSpec((block_b, IN_SIZE), lambda i: (i, 0)),   # x (already 128 wide)
            const2d((PAD, PAD)), const2d((1, PAD)),               # w1, b1
            const2d((PAD, PAD)), const2d((1, PAD)),               # w2, b2
            const2d((PAD, PAD)), const2d((1, PAD)),               # w3, b3
            const2d((PAD, PAD)), const2d((1, PAD)),               # w4, b4
        ],
        out_specs=[
            pl.BlockSpec((block_b, OUT_SIZE), lambda i: (i, 0)),  # a (true 64-wide)
            pl.BlockSpec((block_b, IN_SIZE), lambda i: (i, 0)),   # y (lane-dense 128)
        ],
    )

    wbytes = sum(int(v.size) * v.dtype.itemsize for v in params.values())
    flops = 2 * B * (PAD * PAD) * 4
    transcendentals = B * (PAD + PAD)                             # tanh for a, tanh for y
    bytes_accessed = B * (IN_SIZE + OUT_SIZE + IN_SIZE) * 4 + wbytes

    cp_kwargs = dict(dimension_semantics=("parallel",))
    if block_b >= 2048:
        cp_kwargs["vmem_limit_bytes"] = 48 * 1024 * 1024          # stay under v7x's 64 MiB

    a, y = pl.pallas_call(
        autoencoder_kernel,
        grid_spec=grid_spec,
        out_shape=(
            jax.ShapeDtypeStruct((B, OUT_SIZE), jnp.float32),
            jax.ShapeDtypeStruct((B, IN_SIZE), jnp.float32),
        ),
        compiler_params=pltpu.CompilerParams(**cp_kwargs),
        cost_estimate=pl.CostEstimate(
            flops=flops,
            transcendentals=transcendentals,
            bytes_accessed=bytes_accessed),
    )(x,
      params["w1"], params["b1"], params["w2"], params["b2"],
      params["w3"], params["b3"], params["w4"], params["b4"])

    return a, y


def init_params(key):
    """Deterministic init mimicking nn.Linear (uniform +- 1/sqrt(fan_in)).

    Weights stored already transposed to (fan_in, fan_out); biases as (1, fan_out).
    """
    def linear(key, fan_in, fan_out):
        kw, kb = jax.random.split(key)
        bound = 1.0 / jnp.sqrt(fan_in)
        w = jax.random.uniform(kw, (fan_in, fan_out), jnp.float32, -bound, bound)
        b = jax.random.uniform(kb, (1, fan_out), jnp.float32, -bound, bound)
        return w, b

    k1, k2, k3, k4 = jax.random.split(key, 4)
    w1, b1 = linear(k1, IN_SIZE, INTER_SIZE)
    w2, b2 = linear(k2, INTER_SIZE, OUT_SIZE)
    w3, b3 = linear(k3, OUT_SIZE, INTER_SIZE)
    w4, b4 = linear(k4, INTER_SIZE, IN_SIZE)
    return {"w1": w1, "b1": b1, "w2": w2, "b2": b2,
            "w3": w3, "b3": b3, "w4": w4, "b4": b4}


def reference_forward(x, params):
    h1 = _leaky_relu(x @ params["w1"] + params["b1"])
    a = jax.nn.sigmoid(h1 @ params["w2"] + params["b2"])
    h3 = _leaky_relu(a @ params["w3"] + params["b3"])
    y = jnp.tanh(h3 @ params["w4"] + params["b4"])
    return a, y


if __name__ == "__main__":
    key = jax.random.PRNGKey(0)
    kx, kp = jax.random.split(key)

    # Batch that is not a multiple of the chosen block -> exercises the ragged
    # final block and a multi-step ("parallel") grid.
    B = 500
    x = jax.random.normal(kx, (B, IN_SIZE), dtype=jnp.float32)
    raw_params = init_params(kp)
    a_gold, y_gold = reference_forward(x, raw_params)

    # Exact f32-MXU path.
    p_f32 = prepare_params(raw_params, mxu_bf16=False)
    a32, y32 = autoencoder_forward(x, p_f32)
    jax.block_until_ready((a32, y32))
    assert a32.shape == (B, OUT_SIZE) and y32.shape == (B, IN_SIZE)
    assert jnp.allclose(a32, a_gold, atol=2e-5, rtol=2e-5), "bottleneck mismatch (f32)"
    assert jnp.allclose(y32, y_gold, atol=2e-5, rtol=2e-5), "reconstruction mismatch (f32)"

    # Fast bf16-MXU path (f32 accumulation); looser tolerance by construction.
    p_bf16 = prepare_params(raw_params, mxu_bf16=True)
    abf, ybf = autoencoder_forward(x, p_bf16)
    jax.block_until_ready((abf, ybf))
    assert abf.shape == (B, OUT_SIZE) and ybf.shape == (B, IN_SIZE)
    assert jnp.allclose(abf, a_gold, atol=3e-2, rtol=3e-2), "bottleneck mismatch (bf16)"
    assert jnp.allclose(ybf, y_gold, atol=3e-2, rtol=3e-2), "reconstruction mismatch (bf16)"

    print("KERNEL_OK")
</pallas_src>

<mosaic_0001>
module attributes {stable_mosaic.version = 11 : i64} {
  func.func @autoencoder_kernel(%arg0: i32, %arg1: memref<248x128xf32, #tpu.memory_space<vmem>>, %arg2: memref<128x128xf32, #tpu.memory_space<vmem>>, %arg3: memref<1x128xf32, #tpu.memory_space<vmem>>, %arg4: memref<128x128xf32, #tpu.memory_space<vmem>>, %arg5: memref<1x128xf32, #tpu.memory_space<vmem>>, %arg6: memref<128x128xf32, #tpu.memory_space<vmem>>, %arg7: memref<1x128xf32, #tpu.memory_space<vmem>>, %arg8: memref<128x128xf32, #tpu.memory_space<vmem>>, %arg9: memref<1x128xf32, #tpu.memory_space<vmem>>, %arg10: memref<248x64xf32, #tpu.memory_space<vmem>>, %arg11: memref<248x128xf32, #tpu.memory_space<vmem>>) attributes {dimension_semantics = [#tpu.dimension_semantics<parallel>], iteration_bounds = array<i64: 3>, scalar_prefetch = 0 : i64, scratch_operands = 0 : i64, tpu.core_type = #tpu.core_type<tc>, window_params = [{transform_indices = @transform_0, window_bounds = array<i64: 248, 128>}, {pipeline_mode = #tpu.pipeline_mode<synchronous>, transform_indices = @transform_1, window_bounds = array<i64: 128, 128>}, {pipeline_mode = #tpu.pipeline_mode<synchronous>, transform_indices = @transform_2, window_bounds = array<i64: 1, 128>}, {pipeline_mode = #tpu.pipeline_mode<synchronous>, transform_indices = @transform_3, window_bounds = array<i64: 128, 128>}, {pipeline_mode = #tpu.pipeline_mode<synchronous>, transform_indices = @transform_4, window_bounds = array<i64: 1, 128>}, {pipeline_mode = #tpu.pipeline_mode<synchronous>, transform_indices = @transform_5, window_bounds = array<i64: 128, 128>}, {pipeline_mode = #tpu.pipeline_mode<synchronous>, transform_indices = @transform_6, window_bounds = array<i64: 1, 128>}, {pipeline_mode = #tpu.pipeline_mode<synchronous>, transform_indices = @transform_7, window_bounds = array<i64: 128, 128>}, {pipeline_mode = #tpu.pipeline_mode<synchronous>, transform_indices = @transform_8, window_bounds = array<i64: 1, 128>}, {transform_indices = @transform_9, window_bounds = array<i64: 248, 64>}, {transform_indices = @transform_10, window_bounds = array<i64: 248, 128>}]} {
    %c0 = arith.constant 0 : index
    %c0_0 = arith.constant 0 : index
    %0 = vector.load %arg1[%c0, %c0_0] : memref<248x128xf32, #tpu.memory_space<vmem>>, vector<248x128xf32>
    %c0_1 = arith.constant 0 : index
    %c0_2 = arith.constant 0 : index
    %1 = vector.load %arg2[%c0_1, %c0_2] : memref<128x128xf32, #tpu.memory_space<vmem>>, vector<128x128xf32>
    %cst = arith.constant dense<0.000000e+00> : vector<248x128xf32>
    %2 = tpu.matmul %0, %1, %cst {dimension_numbers = #tpu.dot_dimension_numbers<[1], [0], [0], [1], [0, 0, 1, 1], [], []>} : vector<248x128xf32>, vector<128x128xf32>, vector<248x128xf32> -> vector<248x128xf32>
    %c0_3 = arith.constant 0 : index
    %c0_4 = arith.constant 0 : index
    %3 = vector.load %arg3[%c0_3, %c0_4] : memref<1x128xf32, #tpu.memory_space<vmem>>, vector<1x128xf32>
    %4 = vector.broadcast %3 : vector<1x128xf32> to vector<248x128xf32>
    %5 = arith.addf %2, %4 : vector<248x128xf32>
    %cst_5 = arith.constant 0.00999999977 : f32
    %6 = vector.broadcast %cst_5 : f32 to vector<248x128xf32>
    %7 = arith.mulf %6, %5 : vector<248x128xf32>
    %8 = arith.maximumf %5, %7 : vector<248x128xf32>
    %c0_6 = arith.constant 0 : index
    %c0_7 = arith.constant 0 : index
    %9 = vector.load %arg4[%c0_6, %c0_7] : memref<128x128xf32, #tpu.memory_space<vmem>>, vector<128x128xf32>
    %cst_8 = arith.constant dense<0.000000e+00> : vector<248x128xf32>
    %10 = tpu.matmul %8, %9, %cst_8 {dimension_numbers = #tpu.dot_dimension_numbers<[1], [0], [0], [1], [0, 0, 1, 1], [], []>} : vector<248x128xf32>, vector<128x128xf32>, vector<248x128xf32> -> vector<248x128xf32>
    %c0_9 = arith.constant 0 : index
    %c0_10 = arith.constant 0 : index
    %11 = vector.load %arg5[%c0_9, %c0_10] : memref<1x128xf32, #tpu.memory_space<vmem>>, vector<1x128xf32>
    %12 = vector.broadcast %11 : vector<1x128xf32> to vector<248x128xf32>
    %13 = arith.addf %10, %12 : vector<248x128xf32>
    %cst_11 = arith.constant 5.000000e-01 : f32
    %14 = vector.broadcast %cst_11 : f32 to vector<248x128xf32>
    %15 = arith.mulf %14, %13 : vector<248x128xf32>
    %16 = math.tanh %15 : vector<248x128xf32>
    %cst_12 = arith.constant 5.000000e-01 : f32
    %17 = vector.broadcast %cst_12 : f32 to vector<248x128xf32>
    %18 = arith.mulf %17, %16 : vector<248x128xf32>
    %cst_13 = arith.constant 5.000000e-01 : f32
    %19 = vector.broadcast %cst_13 : f32 to vector<248x128xf32>
    %20 = arith.addf %18, %19 : vector<248x128xf32>
    %21 = vector.extract_strided_slice %20 {offsets = [0, 0], sizes = [248, 64], strides = [1, 1]} : vector<248x128xf32> to vector<248x64xf32>
    %c0_14 = arith.constant 0 : index
    %c0_15 = arith.constant 0 : index
    %22 = vector.load %arg10[%c0_14, %c0_15] : memref<248x64xf32, #tpu.memory_space<vmem>>, vector<248x64xf32>
    tpu.vector_store %arg10[%c0_14, %c0_15], %21 {strides = array<i32>} : memref<248x64xf32, #tpu.memory_space<vmem>>, vector<248x64xf32>,
    %c0_16 = arith.constant 0 : index
    %c0_17 = arith.constant 0 : index
    %23 = vector.load %arg6[%c0_16, %c0_17] : memref<128x128xf32, #tpu.memory_space<vmem>>, vector<128x128xf32>
    %cst_18 = arith.constant dense<0.000000e+00> : vector<248x128xf32>
    %24 = tpu.matmul %20, %23, %cst_18 {dimension_numbers = #tpu.dot_dimension_numbers<[1], [0], [0], [1], [0, 0, 1, 1], [], []>} : vector<248x128xf32>, vector<128x128xf32>, vector<248x128xf32> -> vector<248x128xf32>
    %c0_19 = arith.constant 0 : index
    %c0_20 = arith.constant 0 : index
    %25 = vector.load %arg7[%c0_19, %c0_20] : memref<1x128xf32, #tpu.memory_space<vmem>>, vector<1x128xf32>
    %26 = vector.broadcast %25 : vector<1x128xf32> to vector<248x128xf32>
    %27 = arith.addf %24, %26 : vector<248x128xf32>
    %cst_21 = arith.constant 0.00999999977 : f32
    %28 = vector.broadcast %cst_21 : f32 to vector<248x128xf32>
    %29 = arith.mulf %28, %27 : vector<248x128xf32>
    %30 = arith.maximumf %27, %29 : vector<248x128xf32>
    %c0_22 = arith.constant 0 : index
    %c0_23 = arith.constant 0 : index
    %31 = vector.load %arg8[%c0_22, %c0_23] : memref<128x128xf32, #tpu.memory_space<vmem>>, vector<128x128xf32>
    %cst_24 = arith.constant dense<0.000000e+00> : vector<248x128xf32>
    %32 = tpu.matmul %30, %31, %cst_24 {dimension_numbers = #tpu.dot_dimension_numbers<[1], [0], [0], [1], [0, 0, 1, 1], [], []>} : vector<248x128xf32>, vector<128x128xf32>, vector<248x128xf32> -> vector<248x128xf32>
    %c0_25 = arith.constant 0 : index
    %c0_26 = arith.constant 0 : index
    %33 = vector.load %arg9[%c0_25, %c0_26] : memref<1x128xf32, #tpu.memory_space<vmem>>, vector<1x128xf32>
    %34 = vector.broadcast %33 : vector<1x128xf32> to vector<248x128xf32>
    %35 = arith.addf %32, %34 : vector<248x128xf32>
    %36 = math.tanh %35 : vector<248x128xf32>
    %c0_27 = arith.constant 0 : index
    %c0_28 = arith.constant 0 : index
    %37 = vector.load %arg11[%c0_27, %c0_28] : memref<248x128xf32, #tpu.memory_space<vmem>>, vector<248x128xf32>
    tpu.vector_store %arg11[%c0_27, %c0_28], %36 {strides = array<i32>} : memref<248x128xf32, #tpu.memory_space<vmem>>, vector<248x128xf32>,
    return
  }
  func.func @transform_0(%arg0: i32) -> (i32, i32) {
    %c0_i32 = arith.constant 0 : i32
    %c0_i32_0 = arith.constant 0 : i32
    return %arg0, %c0_i32 : i32, i32
  }
  func.func @transform_1(%arg0: i32) -> (i32, i32) {
    %c0_i32 = arith.constant 0 : i32
    %c0_i32_0 = arith.constant 0 : i32
    %c0_i32_1 = arith.constant 0 : i32
    return %c0_i32, %c0_i32_0 : i32, i32
  }
  func.func @transform_2(%arg0: i32) -> (i32, i32) {
    %c0_i32 = arith.constant 0 : i32
    %c0_i32_0 = arith.constant 0 : i32
    %c0_i32_1 = arith.constant 0 : i32
    return %c0_i32, %c0_i32_0 : i32, i32
  }
  func.func @transform_3(%arg0: i32) -> (i32, i32) {
    %c0_i32 = arith.constant 0 : i32
    %c0_i32_0 = arith.constant 0 : i32
    %c0_i32_1 = arith.constant 0 : i32
    return %c0_i32, %c0_i32_0 : i32, i32
  }
  func.func @transform_4(%arg0: i32) -> (i32, i32) {
    %c0_i32 = arith.constant 0 : i32
    %c0_i32_0 = arith.constant 0 : i32
    %c0_i32_1 = arith.constant 0 : i32
    return %c0_i32, %c0_i32_0 : i32, i32
  }
  func.func @transform_5(%arg0: i32) -> (i32, i32) {
    %c0_i32 = arith.constant 0 : i32
    %c0_i32_0 = arith.constant 0 : i32
    %c0_i32_1 = arith.constant 0 : i32
    return %c0_i32, %c0_i32_0 : i32, i32
  }
  func.func @transform_6(%arg0: i32) -> (i32, i32) {
    %c0_i32 = arith.constant 0 : i32
    %c0_i32_0 = arith.constant 0 : i32
    %c0_i32_1 = arith.constant 0 : i32
    return %c0_i32, %c0_i32_0 : i32, i32
  }
  func.func @transform_7(%arg0: i32) -> (i32, i32) {
    %c0_i32 = arith.constant 0 : i32
    %c0_i32_0 = arith.constant 0 : i32
    %c0_i32_1 = arith.constant 0 : i32
    return %c0_i32, %c0_i32_0 : i32, i32
  }
  func.func @transform_8(%arg0: i32) -> (i32, i32) {
    %c0_i32 = arith.constant 0 : i32
    %c0_i32_0 = arith.constant 0 : i32
    %c0_i32_1 = arith.constant 0 : i32
    return %c0_i32, %c0_i32_0 : i32, i32
  }
  func.func @transform_9(%arg0: i32) -> (i32, i32) {
    %c0_i32 = arith.constant 0 : i32
    %c0_i32_0 = arith.constant 0 : i32
    return %arg0, %c0_i32 : i32, i32
  }
  func.func @transform_10(%arg0: i32) -> (i32, i32) {
    %c0_i32 = arith.constant 0 : i32
    %c0_i32_0 = arith.constant 0 : i32
    return %arg0, %c0_i32 : i32, i32
  }
}

</mosaic_0001>

<bundles_post_ra>
// kernel: autoencoder_forward.1
= control target key start
LH: loop header
LB: loop body
LE: loop exit
PB: predicated region body
PF: predicated region fallthrough
CT: control target
= control target key end

     0   :  { %s4556_s0 = inlined_call_operand.hbm [shape: f32[500,128], index: 0, kind: input, shape index: {}]   ;;  %s4557_s1 = inlined_call_operand.hbm [shape: f32[128,128], index: 1, kind: input, shape index: {}]   ;;  %s4558_s2 = inlined_call_operand.vmem [shape: f32[1,128], index: 2, kind: input, shape index: {}]   ;;  %s4559_s3 = inlined_call_operand.hbm [shape: f32[128,128], index: 3, kind: input, shape index: {}]   ;;  %s4560_s4 = inlined_call_operand.vmem [shape: f32[1,128], index: 4, kind: input, shape index: {}]   ;;  %s4561_s5 = inlined_call_operand.hbm [shape: f32[128,128], index: 5, kind: input, shape index: {}]   ;;  %s4562_s6 = inlined_call_operand.vmem [shape: f32[1,128], index: 6, kind: input, shape index: {}]   ;;  %s4563_s7 = inlined_call_operand.hbm [shape: f32[128,128], index: 7, kind: input, shape index: {}]   ;;  %s4564_s8 = inlined_call_operand.vmem [shape: f32[1,128], index: 8, kind: input, shape index: {}]   ;;  %s4565_s9 = inlined_call_operand.vmem [shape: f32[500,64], index: 9, kind: output, shape index: {0}]   ;;  %s4566_s10 = inlined_call_operand.hbm [shape: f32[500,128], index: 10, kind: output, shape index: {1}]  }
   0x1   :  { %4571 = sst [smem:[#allocation20_spill]] %s4556_s0 }
   0x2   :  { %4572 = sst [smem:[#allocation21_spill]] %s4557_s1 }
   0x3   :  { %4573 = sst [smem:[#allocation22_spill]] %s4558_s2 }
   0x4   :  { %4574 = sst [smem:[#allocation23_spill]] %s4559_s3 }
   0x5   :  { %4575 = sst [smem:[#allocation24_spill]] %s4560_s4 }
   0x6   :  { %16 = vsyncpa [#allocation3], 0 }
   0x7   :  { %18 = vsyncpa [#allocation3 + $0x1], 0 }
   0x8   :  { %19 = vsyncpa [#allocation6], 0 }
   0x9   :  { %20 = vsyncpa [#allocation9], 0 }
   0xa   :  { %21 = vsyncpa [#allocation4], 0 }
   0xb   :  { %23 = vsyncpa [#allocation4 + $0x1], 0  ;;  %s3604_s13 = smov 0   ;;  %s3606_s14 = smov 0  }
   0xc   :  { %s3608_s15 = smov 0   ;;  %s3610_s16 = smov 0  }
   0xd LB: > { %s3625_s17 = sadd.s32 4294967295, %s3501_s16   ;;  %s2255_s18 = sadd.s32 4294967294, %s3501_s16   ;;  %s3501_s16 = sphi %s3610_s16, %s4605_s16   ;;  %s3497_s15 = sphi %s3608_s15, %s4609_s15   ;;  %s3493_s14 = sphi %s3606_s14, %s4608_s14   ;;  %s3489_s13 = sphi %s3604_s13, %s4607_s13  }
   0xe   : > { %s3629_s19 = sadd.s32 1, %s3501_s16   ;;  %s36_s20 = sadd.s32 1, %s3497_s15 }
   0xf   : > { %4576 = sst [smem:[#allocation17_spill]] %s3629_s19  ;;  %s33_s21 = ssub.s32 %s3501_s16, %s3629_s19 }
  0x10   : > { %p43_p0 = scmp.ne.s32.totalorder %s3497_s15, %s3493_s14  ;;  %p34_p1 = scmp.eq.s32.totalorder %s33_s21, 0 }
  0x11   : > { %p44_p2 = scmp.eq.s32.totalorder %s3501_s16, 0  ;;  %p49_p3 = scmp.ne.s32.totalorder %s3493_s14, %s3489_s13 }
  0x12   : > { %p4570_p4 = scmp.eq.s32.totalorder %s3625_s17, 0  ;;  %p241_p7 = scmp.eq.s32.totalorder %s3625_s17, 2 }
  0x13   : > { %s3641_s22 = scalar_select %p34_p1, %s3497_s15, %s36_s20  }
  0x14   : > { %p3643_p5 = por %p44_p2, %p43_p0  ;;  %p3649_p6 = por %p4570_p4, %p49_p3 }
  0x15   : > { %4577 = sst [smem:[#allocation18_spill]] %s3641_s22  ;;  %p273_p8 = scmp.eq.s32.totalorder %s2255_s18, 2 }
  0x16   : > { %p2256_p9 = scmp.ge.s32.totalorder %s3501_s16, 1  ;;  %p280_p10 = scmp.lt.s32.totalorder %s3501_s16, 4 }
  0x17   : > { %p3656_p11 = por %p241_p7, %p43_p0  ;;  %p3660_p12 = por %p273_p8, %p49_p3 }
  0x18   : > { %p3664_p13 = pnand %p2256_p9, %p280_p10  ;;  %s3535_s28 = smov [#allocation5]  }
  0x19   : > { %s4580_s25 = scalar_select %p3656_p11, 1, 0 }
  0x1a   : > { %s4581_s26 = scalar_select %p3660_p12, 1, 0 }
  0x1b   : > { %p3004_p1 = pneg %p3664_p13  ;;  %s292_s29 = sshll.u32 %s3535_s28, 4  ;;  %s293_s29 = int_to_ptr.vmem [resolvable:$true] %s292_s29 }
  0x1c   : > { %4582 = sst [smem:[#allocation19_spill]] %s4581_s26  ;;  %s3536_s11 = smov [#allocation8]  }
  0x1d   : > { %p3672_p2 = pnand %p3004_p1, %p4570_p4  ;;  %s324_s12 = sshll.u32 %s3536_s11, 4  ;;  %s325_s12 = int_to_ptr.vmem [resolvable:$true] %s324_s12 }
  0x1e   : > { %s3278_s18 = scalar_lea.vmem %s293_s29, 2048  ;;  %p3286_p9 = scmp.lt.s32.totalorder %s293_s29, %s293_s29 }
  0x1f   : > { %p3269_p0 = pneg %p3672_p2  ;;  %p3279_p3 = scmp.ne.s32.totalorder %s293_s29, %s3278_s18 }
  0x20   : > { %p3287_p10 = scmp.lt.s32.totalorder %s3278_s18, %s3278_s18 }
  0x21   : > { %p3281_p7 = pnand %p3279_p3, %p3269_p0 }
  0x22   : > { %p3288_p12 = por %p3287_p10, %p3286_p9 }
  0x23   : > { %p3282_p8 = pneg %p3281_p7 }
  0x25   : > { %p3289_p1 = pnand %p3288_p12, %p3282_p8 }
  0x27   : > { %3292 = shalt.err (!%p3289_p1)
}
  0x28   : > { %s3537_s20 = smov 128   ;;  %s3538_s21 = smov 8  }
  0x29   : > { %s4585_s1 = sld [smem:[#allocation21_spill]]  ;;  %s3304_s22 = scalar_lea.vmem %s325_s12, 2048 }
  0x2a   : > { %p3305_p3 = scmp.ne.s32.totalorder %s325_s12, %s3304_s22  ;;  %p3312_p12 = scmp.lt.s32.totalorder %s325_s12, %s325_s12 }
  0x2b   : > { %p3313_p8 = scmp.lt.s32.totalorder %s3304_s22, %s3304_s22 }
  0x2c   : > { %p3307_p7 = pnand %p3305_p3, %p3269_p0 }
  0x2d   : > { %p3314_p10 = por %p3313_p8, %p3312_p12 }
  0x2e   : > { %p3308_p9 = pneg %p3307_p7 }
  0x2f   : > { %3007 = dma.hbm_to_vmem [thread:$0]  (!%p3672_p2), %s4585_s1, 2048, %s293_s29, [#allocation6], %s3537_s20, %s3537_s20, %s3538_s21  }
  0x30   : > { %p3315_p1 = pnand %p3314_p10, %p3308_p9 }
  0x32   : > { %3318 = shalt.err (!%p3315_p1)
}
  0x33   : > { %3013 = dma.hbm_to_vmem [thread:$0]  (!%p3672_p2), %s4561_s5, 2048, %s325_s12, [#allocation9], %s3537_s20, %s3537_s20, %s3538_s21  }
  0x34   : > { %s3539_s29 = smov [#allocation7]   ;;  %s3540_s11 = smov [#allocation10]  }
  0x35   : > { %s308_s28 = sshll.u32 %s3539_s29, 4  ;;  %s340_s1 = sshll.u32 %s3540_s11, 4  ;;  %s309_s28 = int_to_ptr.vmem [resolvable:$true] %s308_s28  ;;  %s341_s1 = int_to_ptr.vmem [resolvable:$true] %s340_s1 }
  0x36   : > { %s3330_s26 = scalar_lea.vmem %s309_s28, 2048  ;;  %p3338_p12 = scmp.lt.s32.totalorder %s309_s28, %s309_s28 }
  0x37   : > { %p3331_p3 = scmp.ne.s32.totalorder %s309_s28, %s3330_s26  ;;  %p3339_p8 = scmp.lt.s32.totalorder %s3330_s26, %s3330_s26 }
  0x39   : > { %p3333_p7 = pnand %p3331_p3, %p3269_p0  ;;  %p3340_p10 = por %p3339_p8, %p3338_p12 }
  0x3b   : > { %p3334_p9 = pneg %p3333_p7 }
  0x3d   : > { %p3341_p1 = pnand %p3340_p10, %p3334_p9 }
  0x3f   : > { %3344 = shalt.err (!%p3341_p1)
}
  0x40   : > { %s4586_s3 = sld [smem:[#allocation23_spill]]  ;;  %s3356_s12 = scalar_lea.vmem %s341_s1, 2048 }
  0x41   : > { %p3357_p4 = scmp.ne.s32.totalorder %s341_s1, %s3356_s12  ;;  %p3364_p12 = scmp.lt.s32.totalorder %s341_s1, %s341_s1 }
  0x42   : > { %p3365_p9 = scmp.lt.s32.totalorder %s3356_s12, %s3356_s12 }
  0x43   : > { %p3359_p3 = pnand %p3357_p4, %p3269_p0 }
  0x44   : > { %p3366_p8 = por %p3365_p9, %p3364_p12 }
  0x45   : > { %p3360_p7 = pneg %p3359_p3 }
  0x46   : > { %3010 = dma.hbm_to_vmem [thread:$0]  (!%p3672_p2), %s4586_s3, 2048, %s309_s28, [#allocation6], %s3537_s20, %s3537_s20, %s3538_s21  }
  0x47   : > { %p3367_p10 = pnand %p3366_p8, %p3360_p7 }
  0x49   : > { %3370 = shalt.err (!%p3367_p10)
}
  0x4a   : > { %3016 = dma.hbm_to_vmem [thread:$0]  (!%p3672_p2), %s4563_s7, 2048, %s341_s1, [#allocation9], %s3537_s20, %s3537_s20, %s3538_s21  }
  0x4b   : > { %p2261_p1 = scmp.ge.s32.totalorder %s3501_s16, 3 }
  0x4d   : > { %353 = sbr.rel (%p2261_p1) target bundleno = 121 (0x79), region = 48 }
  0x52   : > { %356 = sbr.rel (!%p3643_p5) target bundleno = 121 (0x79), region = 52  ;;  %s357_s29 = sand.u32 (%p3643_p5), 1, %s3497_s15  }
  0x53   : > { %s362_s28 = smul.u32 (%p3643_p5), 31, %s3501_s16  ;;  %s3730_s12 = scalar_lea.sflag (%p3643_p5), [#allocation3], %s357_s29 }
  0x54   : > { %s2984_s11 = smul.u32 (%p3643_p5), 248, %s357_s29 }
  0x55   : > { %s363_s19 = ssub.s32 (%p3643_p5), 63, %s362_s28 }
  0x56   : > { %p364_p4 = scmp.lt.s32.totalorder (%p3643_p5), %s363_s19, 31  ;;  %s361_s1 = scalar_lea.vmem (%p3643_p5), [#allocation2], %s2984_s11 }
  0x58   : > { %s4611_s19 = smov (!%p364_p4, %s363_s19), 31 }
  0x59   : > { %s3727_s30 = sshll.u32 %s4611_s19, 7 }
  0x5a   : > { %s368_s22 = ssub.s32 3968, %s3727_s30 }
  0x5b   : > { %369 = vsyncadd %s3730_s12, %s368_s22  ;;  %p2263_p5 = scmp.ne.s32.totalorder %s3727_s30, 0  ;;  %s2293_s23 = smul.u32 3968, %s3501_s16 }
  0x5c   : > { %s374_s20 = sshll.u32 %s361_s1, 4  ;;  %s4587_s0 = sld [smem:[#allocation20_spill]]  ;;  %s3740_s20 = int_to_ptr.vmem [resolvable:$true] %s374_s20 }
  0x62   : > { %s3738_s18 = scalar_lea.hbm %s4587_s0, %s2293_s23  ;;  %s3375_s19 = scalar_lea.hbm %s4587_s0, 8064 }
  0x63   : > { %s3371_s29 = scalar_lea.hbm %s3738_s18, %s3727_s30  ;;  %p3376_p7 = scmp.lt.s32.totalorder %s3738_s18, %s4587_s0 }
  0x64   : > { %p3372_p2 = scmp.ne.s32.totalorder %s3738_s18, %s3371_s29  ;;  %p3377_p12 = scmp.lt.s32.totalorder %s3375_s19, %s3371_s29 }
  0x66   : > { %p3373_p0 = pnand %p3372_p2, %p2263_p5  ;;  %p3378_p9 = por %p3377_p12, %p3376_p7 }
  0x68   : > { %p3374_p3 = pneg %p3373_p0 }
  0x6a   : > { %p3379_p8 = pnand %p3378_p9, %p3374_p3 }
  0x6c   : > { %3382 = shalt.err (!%p3379_p8)
}
  0x6d   : > { %s3383_s23 = scalar_lea.vmem %s3740_s20, %s3727_s30  ;;  %s3541_s21 = smov [#allocation2]  }
  0x6e   : > { %p3384_p10 = scmp.ne.s32.totalorder %s3740_s20, %s3383_s23  ;;  %s3387_s26 = sshll.u32 %s3541_s21, 4  ;;  %s3388_s26 = int_to_ptr.vmem [resolvable:$false] %s3387_s26 }
  0x6f   : > { %s3389_s28 = scalar_lea.vmem %s3388_s26, 7936  ;;  %p3390_p2 = scmp.lt.s32.totalorder %s3740_s20, %s3388_s26 }
  0x70   : > { %p3385_p1 = pnand %p3384_p10, %p2263_p5  ;;  %p3391_p0 = scmp.lt.s32.totalorder %s3389_s28, %s3383_s23 }
  0x72   : > { %p3386_p4 = pneg %p3385_p1  ;;  %p3392_p11 = por %p3391_p0, %p3390_p2 }
  0x74   : > { %p3393_p7 = pnand %p3392_p11, %p3386_p4 }
  0x76   : > { %3396 = shalt.err (!%p3393_p7)
}
  0x77   : > { %s3542_s29 = smov 128   ;;  %s3543_s11 = smov 8  }
  0x78   : > { %380 = dma.hbm_to_vmem [thread:$0]  (%p2263_p5), %s3738_s18, %s3727_s30, %s3740_s20, %s3730_s12, %s3542_s29, %s3542_s29, %s3543_s11  }
  0x79 PF: > { %386 = sbr.rel (%p3664_p13) target bundleno = 1207 (0x4b7), region = 56  ;;  %s3769_s19 = sand.u32 (!%p3664_p13), 1, %s3493_s14  }
  0x7a   : > { %s3772_s22 = smul.u32 (!%p3664_p13), 248, %s3769_s19  ;;  %s389_s1 = scalar_lea.sflag (!%p3664_p13), [#allocation3], %s3769_s19 }
  0x7c   : > { %s3776_s23 = scalar_lea.vmem (!%p3664_p13), [#allocation2], %s3772_s22 }
  0x7e   : > { %3472 = dma.done.wait (%p3649_p6), %s389_s1, 3968  }
  0x7f   : > { %3474 = vsyncadd (%p3649_p6), %s389_s1, 4294963328  ;;  %p4588_p11 = scmp.eq.s32.totalorder %s3625_s17, 0 }
  0x81   : > { %3476 = dma.done.wait (%p4588_p11), [#allocation6], 4096   ;;  %p4589_p13 = pmov %p4588_p11 }
  0x82   : > { %p4590_p5 = pmov %p4588_p11 }
  0x83   : > { %3478 = vsyncadd (%p4589_p13), [#allocation6], 4294963200 }
  0x84   : > { %3480 = dma.done.wait (%p4590_p5), [#allocation9], 4096   ;;  %p4591_p3 = pmov %p4590_p5 }
  0x85   : > { %v3544_v0 = vmov 0.0   ;;  %vm3545_vm0 = vmmov 0   ;;  %v510_v1 = vld [vmem:[#allocation5 + $0x78] sm:$0xff]  ;;  %v509_v2 = vld [vmem:[#allocation5 + $0x70] sm:$0xff]  ;;  %v508_v3 = vld [vmem:[#allocation5 + $0x68] sm:$0xff]  ;;  %s4592_s2 = sld [smem:[#allocation22_spill]] }
  0x86   : > { %3482 = vsyncadd (%p4591_p3), [#allocation9], 4294963200  ;;  %2484 = vmatprep.subr.mxu0 %v3544_v0  ;;  %2516 = vmatprep.mubr.msk.f32.mxu0 %vm3545_vm0, %v3544_v0  ;;  %v507_v4 = vld [vmem:[#allocation5 + $0x60] sm:$0xff]  ;;  %v506_v5 = vld [vmem:[#allocation5 + $0x58] sm:$0xff]  ;;  %s4593_s4 = sld [smem:[#allocation24_spill]]  ;;  %vm1167_vm1 = vcmask 523264  }
  0x87   : > { %2609 = vmatprep.subr.mxu1 %v3544_v0  ;;  %2641 = vmatprep.mubr.msk.f32.mxu1 %vm3545_vm0, %v3544_v0  ;;  %v505_v6 = vld [vmem:[#allocation5 + $0x50] sm:$0xff]  ;;  %v504_v7 = vld [vmem:[#allocation5 + $0x48] sm:$0xff]  ;;  %v503_v8 = vld [vmem:[#allocation5 + $0x40] sm:$0xff]  ;;  %s4052_s20 = scalar_lea.vmem [#allocation11], %s3772_s22   ;;  %s4316_s29 = scalar_lea.vmem [#allocation12], %s3772_s22 }
  0x88   : > { %2485 = vmatpush3.msra.mxu0 %v510_v1  ;;  %v502_v9 = vld [vmem:[#allocation5 + $0x38] sm:$0xff]  ;;  %v501_v10 = vld [vmem:[#allocation5 + $0x30] sm:$0xff]  ;;  %v500_v11 = vld [vmem:[#allocation5 + $0x28] sm:$0xff]  ;;  %p4594_p6 = scmp.ne.s32.totalorder %s4580_s25, 0 }
  0x89   : > { %2486 = vmatprep.subr.mxu0 %v3544_v0  ;;  %v499_v12 = vld [vmem:[#allocation5 + $0x20] sm:$0xff]  ;;  %v498_v13 = vld [vmem:[#allocation5 + $0x18] sm:$0xff]  ;;  %v497_v14 = vld [vmem:[#allocation5 + $0x10] sm:$0xff]  ;;  %s1821_s22 = smul.u32 (%p4594_p6), 31, %s3625_s17 }
  0x8a   : > { %2487 = vmatpush3.msra.mxu0 %v509_v2  ;;  %v815_v15 = vld [vmem:[#allocation7 + $0x78] sm:$0xff]  ;;  %v814_v16 = vld [vmem:[#allocation7 + $0x70] sm:$0xff]  ;;  %v496_v17 = vld [vmem:[#allocation5 + $0x8] sm:$0xff]  ;;  %s2294_s1 = smul.u32 (%p4594_p6), 248, %s3625_s17 }
  0x8b   : > { %2488 = vmatprep.subr.mxu0 %v3544_v0  ;;  %2610 = vmatpush3.msra.mxu1 %v815_v15  ;;  %v813_v18 = vld [vmem:[#allocation7 + $0x68] sm:$0xff]  ;;  %v495_v19 = vld [vmem:[#allocation5] sm:$0xff]  ;;  %v811_v22 = vld [vmem:[#allocation7 + $0x58] sm:$0xff] }
  0x8c   : > { %2489 = vmatpush3.msra.mxu0 %v508_v3  ;;  %2611 = vmatprep.subr.mxu1 %v3544_v0  ;;  %v812_v20 = vld [vmem:[#allocation7 + $0x60] sm:$0xff]  ;;  %v464_v21 = vld [vmem:[%s3776_s23] sm:$0xff]  ;;  %v465_v24 = vld [vmem:[%s3776_s23 + $0x8] sm:$0xff]  ;;  %s4384_s30 = scalar_lea.vmem (%p4594_p6), %s4565_s9, %s2294_s1  }
  0x8d   : > { %2490 = vmatprep.subr.mxu0 %v3544_v0  ;;  %2612 = vmatpush3.msra.mxu1 %v814_v16  ;;  %v810_v23 = vld [vmem:[#allocation7 + $0x50] sm:$0xff]  ;;  %v809_v25 = vld [vmem:[#allocation7 + $0x48] sm:$0xff]  ;;  %v808_v26 = vld [vmem:[#allocation7 + $0x40] sm:$0xff] }
  0x8e   : > { %2491 = vmatpush3.msra.mxu0 %v507_v4  ;;  %2613 = vmatprep.subr.mxu1 %v3544_v0  ;;  %v466_v27 = vld [vmem:[%s3776_s23 + $0x10] sm:$0xff]  ;;  %v806_v29 = vld [vmem:[#allocation7 + $0x30] sm:$0xff]  ;;  %v467_v30 = vld [vmem:[%s3776_s23 + $0x18] sm:$0xff] }
  0x8f   : > { %2492 = vmatprep.subr.mxu0 %v3544_v0  ;;  %2614 = vmatpush3.msra.mxu1 %v813_v18  ;;  %v807_v28 = vld [vmem:[#allocation7 + $0x38] sm:$0xff]  ;;  %v805_v31 = vld [vmem:[#allocation7 + $0x28] sm:$0xff]  ;;  %v804_v32 = vld [vmem:[#allocation7 + $0x20] sm:$0xff] }
  0x90   : > { %2493 = vmatpush3.msra.mxu0 %v506_v5  ;;  %2615 = vmatprep.subr.mxu1 %v3544_v0  ;;  %v468_v33 = vld [vmem:[%s3776_s23 + $0x20] sm:$0xff]  ;;  %v469_v34 = vld [vmem:[%s3776_s23 + $0x28] sm:$0xff]  ;;  %v470_v35 = vld [vmem:[%s3776_s23 + $0x30] sm:$0xff] }
  0x91   : > { %2494 = vmatprep.subr.mxu0 %v3544_v0  ;;  %2616 = vmatpush3.msra.mxu1 %v812_v20  ;;  %v471_v36 = vld [vmem:[%s3776_s23 + $0x38] sm:$0xff]  ;;  %v472_v37 = vld [vmem:[%s3776_s23 + $0x40] sm:$0xff]  ;;  %v473_v38 = vld [vmem:[%s3776_s23 + $0x48] sm:$0xff] }
  0x92   : > { %2495 = vmatpush3.msra.mxu0 %v505_v6  ;;  %2617 = vmatprep.subr.mxu1 %v3544_v0  ;;  %v474_v39 = vld [vmem:[%s3776_s23 + $0x50] sm:$0xff]  ;;  %v475_v40 = vld [vmem:[%s3776_s23 + $0x58] sm:$0xff]  ;;  %v476_v41 = vld [vmem:[%s3776_s23 + $0x60] sm:$0xff] }
  0x93   : > { %2496 = vmatprep.subr.mxu0 %v3544_v0  ;;  %2618 = vmatpush3.msra.mxu1 %v811_v22  ;;  %v477_v42 = vld [vmem:[%s3776_s23 + $0x68] sm:$0xff]  ;;  %v478_v43 = vld [vmem:[%s3776_s23 + $0x70] sm:$0xff]  ;;  %v479_v44 = vld [vmem:[%s3776_s23 + $0x78] sm:$0xff] }
  0x94   : > { %2497 = vmatpush3.msra.mxu0 %v504_v7  ;;  %2619 = vmatprep.subr.mxu1 %v3544_v0  ;;  %v480_v45 = vld [vmem:[%s3776_s23 + $0x80] sm:$0xff]  ;;  %v803_v46 = vld [vmem:[#allocation7 + $0x18] sm:$0xff]  ;;  %v800_v51 = vld [vmem:[#allocation7] sm:$0xff] }
  0x95   : > { %2498 = vmatprep.subr.mxu0 %v3544_v0  ;;  %2620 = vmatpush3.msra.mxu1 %v810_v23  ;;  %v481_v47 = vld [vmem:[%s3776_s23 + $0x88] sm:$0xff]  ;;  %v801_v49 = vld [vmem:[#allocation7 + $0x8] sm:$0xff]  ;;  %v482_v50 = vld [vmem:[%s3776_s23 + $0x90] sm:$0xff] }
  0x96   : > { %2499 = vmatpush3.msra.mxu0 %v503_v8  ;;  %2621 = vmatprep.subr.mxu1 %v3544_v0  ;;  %v802_v48 = vld [vmem:[#allocation7 + $0x10] sm:$0xff]  ;;  %v483_v52 = vld [vmem:[%s3776_s23 + $0x98] sm:$0xff]  ;;  %v486_v55 = vld [vmem:[%s3776_s23 + $0xb0] sm:$0xff] }
  0x97   : > { %2500 = vmatprep.subr.mxu0 %v3544_v0  ;;  %2622 = vmatpush3.msra.mxu1 %v809_v25  ;;  %v484_v53 = vld [vmem:[%s3776_s23 + $0xa0] sm:$0xff]  ;;  %v485_v54 = vld [vmem:[%s3776_s23 + $0xa8] sm:$0xff]  ;;  %v487_v56 = vld [vmem:[%s3776_s23 + $0xb8] sm:$0xff] }
  0x98   : > { %2501 = vmatpush3.msra.mxu0 %v502_v9  ;;  %2623 = vmatprep.subr.mxu1 %v3544_v0  ;;  %v488_v57 = vld [vmem:[%s3776_s23 + $0xc0] sm:$0xff]  ;;  %v489_v58 = vld [vmem:[%s3776_s23 + $0xc8] sm:$0xff]  ;;  %v490_v59 = vld [vmem:[%s3776_s23 + $0xd0] sm:$0xff] }
  0x99   : > { %2502 = vmatprep.subr.mxu0 %v3544_v0  ;;  %2624 = vmatpush3.msra.mxu1 %v808_v26  ;;  %v491_v60 = vld [vmem:[%s3776_s23 + $0xd8] sm:$0xff]  ;;  %v492_v61 = vld [vmem:[%s3776_s23 + $0xe0] sm:$0xff]  ;;  %v493_v62 = vld [vmem:[%s3776_s23 + $0xe8] sm:$0xff] }
  0x9a   : > { %2503 = vmatpush3.msra.mxu0 %v501_v10  ;;  %2625 = vmatprep.subr.mxu1 %v3544_v0  ;;  %v494_v63 = vld [vmem:[%s3776_s23 + $0xf0] sm:$0xff]  ;;  %v1213_v2 = vld [vmem:[#allocation8 + $0x70] sm:$0xff]  ;;  %v1212_v3 = vld [vmem:[#allocation8 + $0x68] sm:$0xff]  ;;  %s1822_s23 = ssub.s32 (%p4594_p6), 63, %s1821_s22 }
  0x9b   : > { %2504 = vmatprep.subr.mxu0 %v3544_v0  ;;  %2626 = vmatpush3.msra.mxu1 %v807_v28  ;;  %v1214_v1 = vld [vmem:[#allocation8 + $0x78] sm:$0xff]  ;;  %v1211_v4 = vld [vmem:[#allocation8 + $0x60] sm:$0xff]  ;;  %v3927_v5 = vld [vmem:[%s4592_s2] ss:$0 sm:$0xff]  ;;  %p1823_p12 = scmp.lt.s32.totalorder (%p4594_p6), %s1822_s23, 31 }
  0x9c   : > { %2505 = vmatpush3.msra.mxu0 %v500_v11  ;;  %2627 = vmatprep.subr.mxu1 %v3544_v0  ;;  %v1210_v6 = vld [vmem:[#allocation8 + $0x58] sm:$0xff]  ;;  %v1209_v7 = vld [vmem:[#allocation8 + $0x50] sm:$0xff]  ;;  %v1208_v10 = vld [vmem:[#allocation8 + $0x48] sm:$0xff] }
  0x9d   : > { %2506 = vmatprep.subr.mxu0 %v3544_v0  ;;  %2628 = vmatpush3.msra.mxu1 %v806_v29  ;;  %v1205_v20 = vld [vmem:[#allocation8 + $0x30] sm:$0xff] }
  0x9e   : > { %2507 = vmatpush3.msra.mxu0 %v499_v12  ;;  %2629 = vmatprep.subr.mxu1 %v3544_v0 }
  0x9f   : > { %2508 = vmatprep.subr.mxu0 %v3544_v0  ;;  %2630 = vmatpush3.msra.mxu1 %v805_v31  ;;  %v1202_v31 = vld [vmem:[#allocation8 + $0x18] sm:$0xff] }
  0xa0   : > { %2509 = vmatpush3.msra.mxu0 %v498_v13  ;;  %2631 = vmatprep.subr.mxu1 %v3544_v0  ;;  %v1207_v13 = vld [vmem:[#allocation8 + $0x40] sm:$0xff] }
  0xa1   : > { %2510 = vmatprep.subr.mxu0 %v3544_v0  ;;  %2632 = vmatpush3.msra.mxu1 %v804_v32 }
  0xa2   : > { %2511 = vmatpush3.msra.mxu0 %v497_v14  ;;  %2633 = vmatprep.subr.mxu1 %v3544_v0 }
  0xa3   : > { %2512 = vmatprep.subr.mxu0 %v3544_v0  ;;  %2634 = vmatpush3.msra.mxu1 %v803_v46 }
  0xa4   : > { %2513 = vmatpush3.msra.mxu0 %v496_v17  ;;  %2635 = vmatprep.subr.mxu1 %v3544_v0  ;;  %v1206_v17 = vld [vmem:[#allocation8 + $0x38] sm:$0xff] }
  0xa5   : > { %2514 = vmatprep.subr.mxu0 %v3544_v0  ;;  %2636 = vmatpush3.msra.mxu1 %v802_v48 }
  0xa6   : > { %2515 = vmatpush3.msra.mxu0 %v495_v19  ;;  %2637 = vmatprep.subr.mxu1 %v3544_v0 }
  0xa7   : > { %2517 = vmatmul.mubr.f32.vlgmr.msra.gmra.mxu0 %v464_v21  ;;  %2734 = vmatprep.subr.mxu0 %v3544_v0 }
  0xa8   : > { %2519 = vmatprep.mubr.msk.f32.mxu0 %vm3545_vm0, %v3544_v0  ;;  %2638 = vmatpush3.msra.mxu1 %v801_v49 }
  0xa9   : > { %2639 = vmatprep.subr.mxu1 %v3544_v0  ;;  %2735 = vmatpush3.msra.mxu0 %v1214_v1 }
  0xaa   : > { %2640 = vmatpush3.msra.mxu1 %v800_v51  ;;  %2736 = vmatprep.subr.mxu0 %v3544_v0 }
  0xab   : > { %2520 = vmatmul.mubr.f32.gmra.mxu0 %v465_v24  ;;  %2859 = vmatprep.subr.mxu1 %v3544_v0  ;;  %v1204_v24 = vld [vmem:[#allocation8 + $0x28] sm:$0xff] }
  0xac   : > { %2522 = vmatprep.mubr.msk.f32.mxu0 %vm3545_vm0, %v3544_v0  ;;  %2737 = vmatpush3.msra.mxu0 %v1213_v2 }
  0xad   : > { %2738 = vmatprep.subr.mxu0 %v3544_v0 }
  0xae   : > { %2739 = vmatpush3.msra.mxu0 %v1212_v3 }
  0xaf   : > { %2523 = vmatmul.mubr.f32.gmra.mxu0 %v466_v27  ;;  %2740 = vmatprep.subr.mxu0 %v3544_v0  ;;  %v1203_v27 = vld [vmem:[#allocation8 + $0x20] sm:$0xff] }
  0xb0   : > { %2525 = vmatprep.mubr.msk.f32.mxu0 %vm3545_vm0, %v3544_v0  ;;  %2741 = vmatpush3.msra.mxu0 %v1211_v4 }
  0xb1   : > { %2742 = vmatprep.subr.mxu0 %v3544_v0 }
  0xb2   : > { %2743 = vmatpush3.msra.mxu0 %v1210_v6 }
  0xb3   : > { %2526 = vmatmul.mubr.f32.gmra.mxu0 %v467_v30  ;;  %2744 = vmatprep.subr.mxu0 %v3544_v0 }
  0xb4   : > { %2528 = vmatprep.mubr.msk.f32.mxu0 %vm3545_vm0, %v3544_v0  ;;  %2745 = vmatpush3.msra.mxu0 %v1209_v7 }
  0xb5   : > { %2746 = vmatprep.subr.mxu0 %v3544_v0 }
  0xb6   : > { %2747 = vmatpush3.msra.mxu0 %v1208_v10 }
  0xb7   : > { %2529 = vmatmul.mubr.f32.gmra.mxu0 %v468_v33  ;;  %2748 = vmatprep.subr.mxu0 %v3544_v0 }
  0xb8   : > { %2531 = vmatprep.mubr.msk.f32.mxu0 %vm3545_vm0, %v3544_v0  ;;  %2749 = vmatpush3.msra.mxu0 %v1207_v13 }
  0xb9   : > { %2750 = vmatprep.subr.mxu0 %v3544_v0 }
  0xba   : > { %2751 = vmatpush3.msra.mxu0 %v1206_v17 }
  0xbb   : > { %2532 = vmatmul.mubr.f32.gmra.mxu0 %v469_v34  ;;  %2752 = vmatprep.subr.mxu0 %v3544_v0 }
  0xbc   : > { %2534 = vmatprep.mubr.msk.f32.mxu0 %vm3545_vm0, %v3544_v0  ;;  %2753 = vmatpush3.msra.mxu0 %v1205_v20 }
  0xbd   : > { %2754 = vmatprep.subr.mxu0 %v3544_v0 }
  0xbe   : > { %2755 = vmatpush3.msra.mxu0 %v1204_v24 }
  0xbf   : > { %2535 = vmatmul.mubr.f32.gmra.mxu0 %v470_v35  ;;  %2756 = vmatprep.subr.mxu0 %v3544_v0 }
  0xc0   : > { %2537 = vmatprep.mubr.msk.f32.mxu0 %vm3545_vm0, %v3544_v0  ;;  %2757 = vmatpush3.msra.mxu0 %v1203_v27 }
  0xc1   : > { %2758 = vmatprep.subr.mxu0 %v3544_v0 }
  0xc2   : > { %2759 = vmatpush3.msra.mxu0 %v1202_v31 }
  0xc3   : > { %2538 = vmatmul.mubr.f32.gmra.mxu0 %v471_v36  ;;  %2760 = vmatprep.subr.mxu0 %v3544_v0 }
  0xc4   : > { %2540 = vmatprep.mubr.msk.f32.mxu0 %vm3545_vm0, %v3544_v0 }
  0xc7   : > { %2541 = vmatmul.mubr.f32.gmra.mxu0 %v472_v37 }
  0xc8   : > { %2543 = vmatprep.mubr.msk.f32.mxu0 %vm3545_vm0, %v3544_v0 }
  0xcb   : > { %2544 = vmatmul.mubr.f32.gmra.mxu0 %v473_v38 }
  0xcc   : > { %2546 = vmatprep.mubr.msk.f32.mxu0 %vm3545_vm0, %v3544_v0 }
  0xcf   : > { %2547 = vmatmul.mubr.f32.gmra.mxu0 %v474_v39 }
  0xd0   : > { %2549 = vmatprep.mubr.msk.f32.mxu0 %vm3545_vm0, %v3544_v0 }
  0xd3   : > { %2550 = vmatmul.mubr.f32.gmra.mxu0 %v475_v40 }
  0xd4   : > { %2552 = vmatprep.mubr.msk.f32.mxu0 %vm3545_vm0, %v3544_v0 }
  0xd7   : > { %2553 = vmatmul.mubr.f32.gmra.mxu0 %v476_v41 }
  0xd8   : > { %2555 = vmatprep.mubr.msk.f32.mxu0 %vm3545_vm0, %v3544_v0 }
  0xdb   : > { %2556 = vmatmul.mubr.f32.gmra.mxu0 %v477_v42 }
  0xdc   : > { %2558 = vmatprep.mubr.msk.f32.mxu0 %vm3545_vm0, %v3544_v0 }
  0xdf   : > { %2559 = vmatmul.mubr.f32.gmra.mxu0 %v478_v43 }
  0xe0   : > { %2561 = vmatprep.mubr.msk.f32.mxu0 %vm3545_vm0, %v3544_v0 }
  0xe3   : > { %2562 = vmatmul.mubr.f32.gmra.mxu0 %v479_v44 }
  0xe4   : > { %2564 = vmatprep.mubr.msk.f32.mxu0 %vm3545_vm0, %v3544_v0 }
  0xe7   : > { %2565 = vmatmul.mubr.f32.gmra.mxu0 %v480_v45 }
  0xe8   : > { %2567 = vmatprep.mubr.msk.f32.mxu0 %vm3545_vm0, %v3544_v0 }
  0xeb   : > { %2568 = vmatmul.mubr.f32.gmra.mxu0 %v481_v47 }
  0xec   : > { %2570 = vmatprep.mubr.msk.f32.mxu0 %vm3545_vm0, %v3544_v0 }
  0xef   : > { %2571 = vmatmul.mubr.f32.gmra.mxu0 %v482_v50 }
  0xf0   : > { %2573 = vmatprep.mubr.msk.f32.mxu0 %vm3545_vm0, %v3544_v0 }
  0xf3   : > { %2574 = vmatmul.mubr.f32.gmra.mxu0 %v483_v52 }
  0xf4   : > { %2576 = vmatprep.mubr.msk.f32.mxu0 %vm3545_vm0, %v3544_v0 }
  0xf7   : > { %2577 = vmatmul.mubr.f32.gmra.mxu0 %v484_v53 }
  0xf8   : > { %2579 = vmatprep.mubr.msk.f32.mxu0 %vm3545_vm0, %v3544_v0 }
  0xfb   : > { %2580 = vmatmul.mubr.f32.gmra.mxu0 %v485_v54 }
  0xfc   : > { %2582 = vmatprep.mubr.msk.f32.mxu0 %vm3545_vm0, %v3544_v0 }
  0xff   : > { %2583 = vmatmul.mubr.f32.gmra.mxu0 %v486_v55 }
 0x100   : > { %2585 = vmatprep.mubr.msk.f32.mxu0 %vm3545_vm0, %v3544_v0 }
 0x103   : > { %2586 = vmatmul.mubr.f32.gmra.mxu0 %v487_v56 }
 0x104   : > { %2588 = vmatprep.mubr.msk.f32.mxu0 %vm3545_vm0, %v3544_v0 }
 0x107   : > { %2589 = vmatmul.mubr.f32.gmra.mxu0 %v488_v57 }
 0x108   : > { %2591 = vmatprep.mubr.msk.f32.mxu0 %vm3545_vm0, %v3544_v0 }
 0x10b   : > { %2592 = vmatmul.mubr.f32.gmra.mxu0 %v489_v58 }
 0x10c   : > { %2594 = vmatprep.mubr.msk.f32.mxu0 %vm3545_vm0, %v3544_v0 }
 0x10f   : > { %2595 = vmatmul.mubr.f32.gmra.mxu0 %v490_v59 }
 0x110   : > { %2597 = vmatprep.mubr.msk.f32.mxu0 %vm3545_vm0, %v3544_v0 }
 0x113   : > { %2598 = vmatmul.mubr.f32.gmra.mxu0 %v491_v60 }
 0x114   : > { %2600 = vmatprep.mubr.msk.f32.mxu0 %vm3545_vm0, %v3544_v0 }
 0x117   : > { %2601 = vmatmul.mubr.f32.gmra.mxu0 %v492_v61 }
 0x118   : > { %2603 = vmatprep.mubr.msk.f32.mxu0 %vm3545_vm0, %v3544_v0 }
 0x11b   : > { %2604 = vmatmul.mubr.f32.gmra.mxu0 %v493_v62 }
 0x11c   : > { %2606 = vmatprep.mubr.msk.f32.mxu0 %vm3545_vm0, %v3544_v0 }
 0x11f   : > { %2607 = vmatmul.mubr.f32.gmra.mxu0 %v494_v63 }
 0x120   : > { %2766 = vmatprep.mubr.msk.f32.mxu0 %vm3545_vm0, %v3544_v0 }
 0x167   : > { %v584_v8 = vpop.f32.mrf.mxu0 }
 0x168   : > { %v585_v9 = vadd.f32 %v3927_v5, %v584_v8 }
 0x169   : > { %v2518_v11 = vpop.f32.mrf.mxu0 }
 0x16a   : > { %v738_v12 = vmul.f32 0.01, %v585_v9 }
 0x16b   : > { %v589_v14 = vpop.f32.mrf.mxu0 }
 0x16c   : > { %v769_v15 = vmax.f32 %v585_v9, %v738_v12  ;;  %v590_v16 = vadd.f32 %v3927_v5, %v589_v14 }
 0x16d   : > { %v2521_v18 = vpop.f32.mrf.mxu0 }
 0x16e   : > { %v739_v19 = vmul.f32 0.01, %v590_v16  ;;  %2642 = vmatmul.mubr.f32.vlgmr.msra.gmra.mxu1 %v769_v15 }
 0x16f   : > { %v594_v21 = vpop.f32.mrf.mxu0  ;;  %2644 = vmatprep.mubr.msk.f32.mxu1 %vm3545_vm0, %v3544_v0 }
 0x170   : > { %v770_v22 = vmax.f32 %v590_v16, %v739_v19  ;;  %v595_v23 = vadd.f32 %v3927_v5, %v594_v21 }
 0x171   : > { %v2524_v25 = vpop.f32.mrf.mxu0 }
 0x172   : > { %v740_v26 = vmul.f32 0.01, %v595_v23  ;;  %2645 = vmatmul.mubr.f32.gmra.mxu1 %v770_v22 }
 0x173   : > { %v599_v28 = vpop.f32.mrf.mxu0  ;;  %2647 = vmatprep.mubr.msk.f32.mxu1 %vm3545_vm0, %v3544_v0 }
 0x174   : > { %v771_v29 = vmax.f32 %v595_v23, %v740_v26  ;;  %v600_v30 = vadd.f32 %v3927_v5, %v599_v28 }
 0x175   : > { %v2527_v32 = vpop.f32.mrf.mxu0 }
 0x176   : > { %v741_v33 = vmul.f32 0.01, %v600_v30  ;;  %2648 = vmatmul.mubr.f32.gmra.mxu1 %v771_v29 }
 0x177   : > { %v604_v34 = vpop.f32.mrf.mxu0  ;;  %2650 = vmatprep.mubr.msk.f32.mxu1 %vm3545_vm0, %v3544_v0 }
 0x178   : > { %v772_v35 = vmax.f32 %v600_v30, %v741_v33  ;;  %v605_v36 = vadd.f32 %v3927_v5, %v604_v34 }
 0x179   : > { %v2530_v37 = vpop.f32.mrf.mxu0 }
 0x17a   : > { %v742_v38 = vmul.f32 0.01, %v605_v36  ;;  %2651 = vmatmul.mubr.f32.gmra.mxu1 %v772_v35 }
 0x17b   : > { %v609_v39 = vpop.f32.mrf.mxu0  ;;  %2653 = vmatprep.mubr.msk.f32.mxu1 %vm3545_vm0, %v3544_v0 }
 0x17c   : > { %v773_v40 = vmax.f32 %v605_v36, %v742_v38  ;;  %v610_v41 = vadd.f32 %v3927_v5, %v609_v39 }
 0x17d   : > { %v2533_v42 = vpop.f32.mrf.mxu0 }
 0x17e   : > { %v743_v43 = vmul.f32 0.01, %v610_v41  ;;  %2654 = vmatmul.mubr.f32.gmra.mxu1 %v773_v40 }
 0x17f   : > { %v614_v44 = vpop.f32.mrf.mxu0  ;;  %2656 = vmatprep.mubr.msk.f32.mxu1 %vm3545_vm0, %v3544_v0 }
 0x180   : > { %v774_v45 = vmax.f32 %v610_v41, %v743_v43  ;;  %v615_v46 = vadd.f32 %v3927_v5, %v614_v44 }
 0x181   : > { %v2536_v47 = vpop.f32.mrf.mxu0 }
 0x182   : > { %v744_v48 = vmul.f32 0.01, %v615_v46  ;;  %2657 = vmatmul.mubr.f32.gmra.mxu1 %v774_v45 }
 0x183   : > { %v619_v49 = vpop.f32.mrf.mxu0  ;;  %2659 = vmatprep.mubr.msk.f32.mxu1 %vm3545_vm0, %v3544_v0 }
 0x184   : > { %v775_v50 = vmax.f32 %v615_v46, %v744_v48  ;;  %v620_v51 = vadd.f32 %v3927_v5, %v619_v49 }
 0x185   : > { %v2539_v52 = vpop.f32.mrf.mxu0 }
 0x186   : > { %v745_v53 = vmul.f32 0.01, %v620_v51  ;;  %2660 = vmatmul.mubr.f32.gmra.mxu1 %v775_v50 }
 0x187   : > { %v624_v54 = vpop.f32.mrf.mxu0  ;;  %2662 = vmatprep.mubr.msk.f32.mxu1 %vm3545_vm0, %v3544_v0 }
 0x188   : > { %v776_v55 = vmax.f32 %v620_v51, %v745_v53  ;;  %v625_v56 = vadd.f32 %v3927_v5, %v624_v54 }
 0x189   : > { %v2542_v57 = vpop.f32.mrf.mxu0 }
 0x18a   : > { %v746_v58 = vmul.f32 0.01, %v625_v56  ;;  %2663 = vmatmul.mubr.f32.gmra.mxu1 %v776_v55 }
 0x18b   : > { %v629_v59 = vpop.f32.mrf.mxu0  ;;  %2665 = vmatprep.mubr.msk.f32.mxu1 %vm3545_vm0, %v3544_v0 }
 0x18c   : > { %v777_v60 = vmax.f32 %v625_v56, %v746_v58  ;;  %v630_v61 = vadd.f32 %v3927_v5, %v629_v59 }
 0x18d   : > { %v2545_v62 = vpop.f32.mrf.mxu0 }
 0x18e   : > { %v747_v63 = vmul.f32 0.01, %v630_v61  ;;  %2666 = vmatmul.mubr.f32.gmra.mxu1 %v777_v60 }
 0x18f   : > { %v634_v1 = vpop.f32.mrf.mxu0  ;;  %2668 = vmatprep.mubr.msk.f32.mxu1 %vm3545_vm0, %v3544_v0 }
 0x190   : > { %v778_v2 = vmax.f32 %v630_v61, %v747_v63  ;;  %v635_v3 = vadd.f32 %v3927_v5, %v634_v1  ;;  %v1201_v63 = vld [vmem:[#allocation8 + $0x10] sm:$0xff] }
 0x191   : > { %v2548_v4 = vpop.f32.mrf.mxu0  ;;  %2761 = vmatpush3.msra.mxu0 %v1201_v63 }
 0x192   : > { %v748_v6 = vmul.f32 0.01, %v635_v3  ;;  %2669 = vmatmul.mubr.f32.gmra.mxu1 %v778_v2  ;;  %2762 = vmatprep.subr.mxu0 %v3544_v0  ;;  %v1200_v4 = vld [vmem:[#allocation8 + $0x8] sm:$0xff] }
 0x193   : > { %v639_v7 = vpop.f32.mrf.mxu0  ;;  %2671 = vmatprep.mubr.msk.f32.mxu1 %vm3545_vm0, %v3544_v0  ;;  %2763 = vmatpush3.msra.mxu0 %v1200_v4 }
 0x194   : > { %v779_v8 = vmax.f32 %v635_v3, %v748_v6  ;;  %v640_v9 = vadd.f32 %v3927_v5, %v639_v7  ;;  %2764 = vmatprep.subr.mxu0 %v3544_v0 }
 0x195   : > { %v2551_v10 = vpop.f32.mrf.mxu0 }
 0x196   : > { %v749_v11 = vmul.f32 0.01, %v640_v9  ;;  %2672 = vmatmul.mubr.f32.gmra.mxu1 %v779_v8  ;;  %v1199_v8 = vld [vmem:[#allocation8] sm:$0xff] }
 0x197   : > { %v644_v12 = vpop.f32.mrf.mxu0  ;;  %2674 = vmatprep.mubr.msk.f32.mxu1 %vm3545_vm0, %v3544_v0  ;;  %2765 = vmatpush3.msra.mxu0 %v1199_v8 }
 0x198   : > { %v780_v13 = vmax.f32 %v640_v9, %v749_v11  ;;  %v645_v14 = vadd.f32 %v3927_v5, %v644_v12 }
 0x199   : > { %v2554_v15 = vpop.f32.mrf.mxu0 }
 0x19a   : > { %v750_v16 = vmul.f32 0.01, %v645_v14  ;;  %2675 = vmatmul.mubr.f32.gmra.mxu1 %v780_v13 }
 0x19b   : > { %v649_v17 = vpop.f32.mrf.mxu0  ;;  %2677 = vmatprep.mubr.msk.f32.mxu1 %vm3545_vm0, %v3544_v0 }
 0x19c   : > { %v781_v18 = vmax.f32 %v645_v14, %v750_v16  ;;  %v650_v19 = vadd.f32 %v3927_v5, %v649_v17 }
 0x19d   : > { %v2557_v20 = vpop.f32.mrf.mxu0 }
 0x19e   : > { %v751_v21 = vmul.f32 0.01, %v650_v19  ;;  %2678 = vmatmul.mubr.f32.gmra.mxu1 %v781_v18 }
 0x19f   : > { %v654_v22 = vpop.f32.mrf.mxu0  ;;  %2680 = vmatprep.mubr.msk.f32.mxu1 %vm3545_vm0, %v3544_v0 }
 0x1a0   : > { %v782_v23 = vmax.f32 %v650_v19, %v751_v21  ;;  %v655_v24 = vadd.f32 %v3927_v5, %v654_v22 }
 0x1a1   : > { %v2560_v25 = vpop.f32.mrf.mxu0 }
 0x1a2   : > { %v752_v26 = vmul.f32 0.01, %v655_v24  ;;  %2681 = vmatmul.mubr.f32.gmra.mxu1 %v782_v23 }
 0x1a3   : > { %v659_v27 = vpop.f32.mrf.mxu0  ;;  %2683 = vmatprep.mubr.msk.f32.mxu1 %vm3545_vm0, %v3544_v0 }
 0x1a4   : > { %v783_v28 = vmax.f32 %v655_v24, %v752_v26  ;;  %v660_v29 = vadd.f32 %v3927_v5, %v659_v27 }
 0x1a5   : > { %v2563_v30 = vpop.f32.mrf.mxu0 }
 0x1a6   : > { %v753_v31 = vmul.f32 0.01, %v660_v29  ;;  %2684 = vmatmul.mubr.f32.gmra.mxu1 %v783_v28 }
 0x1a7   : > { %v664_v32 = vpop.f32.mrf.mxu0  ;;  %2686 = vmatprep.mubr.msk.f32.mxu1 %vm3545_vm0, %v3544_v0 }
 0x1a8   : > { %v784_v33 = vmax.f32 %v660_v29, %v753_v31  ;;  %v665_v34 = vadd.f32 %v3927_v5, %v664_v32 }
 0x1a9   : > { %v2566_v35 = vpop.f32.mrf.mxu0 }
 0x1aa   : > { %v754_v36 = vmul.f32 0.01, %v665_v34  ;;  %2687 = vmatmul.mubr.f32.gmra.mxu1 %v784_v33 }
 0x1ab   : > { %v669_v37 = vpop.f32.mrf.mxu0  ;;  %2689 = vmatprep.mubr.msk.f32.mxu1 %vm3545_vm0, %v3544_v0 }
 0x1ac   : > { %v785_v38 = vmax.f32 %v665_v34, %v754_v36  ;;  %v670_v39 = vadd.f32 %v3927_v5, %v669_v37 }
 0x1ad   : > { %v2569_v40 = vpop.f32.mrf.mxu0 }
 0x1ae   : > { %v755_v41 = vmul.f32 0.01, %v670_v39  ;;  %2690 = vmatmul.mubr.f32.gmra.mxu1 %v785_v38 }
 0x1af   : > { %v674_v42 = vpop.f32.mrf.mxu0  ;;  %2692 = vmatprep.mubr.msk.f32.mxu1 %vm3545_vm0, %v3544_v0 }
 0x1b0   : > { %v786_v43 = vmax.f32 %v670_v39, %v755_v41  ;;  %v675_v44 = vadd.f32 %v3927_v5, %v674_v42 }
 0x1b1   : > { %v2572_v45 = vpop.f32.mrf.mxu0 }
 0x1b2   : > { %v756_v46 = vmul.f32 0.01, %v675_v44  ;;  %2693 = vmatmul.mubr.f32.gmra.mxu1 %v786_v43 }
 0x1b3   : > { %v679_v47 = vpop.f32.mrf.mxu0  ;;  %2695 = vmatprep.mubr.msk.f32.mxu1 %vm3545_vm0, %v3544_v0 }
 0x1b4   : > { %v787_v48 = vmax.f32 %v675_v44, %v756_v46  ;;  %v680_v49 = vadd.f32 %v3927_v5, %v679_v47 }
 0x1b5   : > { %v2575_v50 = vpop.f32.mrf.mxu0 }
 0x1b6   : > { %v757_v51 = vmul.f32 0.01, %v680_v49  ;;  %2696 = vmatmul.mubr.f32.gmra.mxu1 %v787_v48  ;;  %v4038_v50 = vld [vmem:[%s4593_s4] ss:$0 sm:$0xff] }
 0x1b7   : > { %v684_v52 = vpop.f32.mrf.mxu0  ;;  %2698 = vmatprep.mubr.msk.f32.mxu1 %vm3545_vm0, %v3544_v0 }
 0x1b8   : > { %v788_v53 = vmax.f32 %v680_v49, %v757_v51  ;;  %v685_v54 = vadd.f32 %v3927_v5, %v684_v52  ;;  %v1519_v49 = vld [vmem:[#allocation10 + $0x78] sm:$0xff] }
 0x1b9   : > { %v2578_v55 = vpop.f32.mrf.mxu0  ;;  %2860 = vmatpush3.msra.mxu1 %v1519_v49 }
 0x1ba   : > { %v758_v56 = vmul.f32 0.01, %v685_v54  ;;  %2699 = vmatmul.mubr.f32.gmra.mxu1 %v788_v53  ;;  %2861 = vmatprep.subr.mxu1 %v3544_v0 }
 0x1bb   : > { %v689_v57 = vpop.f32.mrf.mxu0  ;;  %2701 = vmatprep.mubr.msk.f32.mxu1 %vm3545_vm0, %v3544_v0 }
 0x1bc   : > { %v789_v58 = vmax.f32 %v685_v54, %v758_v56  ;;  %v690_v59 = vadd.f32 %v3927_v5, %v689_v57 }
 0x1bd   : > { %v2581_v60 = vpop.f32.mrf.mxu0 }
 0x1be   : > { %v759_v61 = vmul.f32 0.01, %v690_v59  ;;  %2702 = vmatmul.mubr.f32.gmra.mxu1 %v789_v58 }
 0x1bf   : > { %v694_v62 = vpop.f32.mrf.mxu0  ;;  %2704 = vmatprep.mubr.msk.f32.mxu1 %vm3545_vm0, %v3544_v0 }
 0x1c0   : > { %v790_v1 = vmax.f32 %v690_v59, %v759_v61  ;;  %v695_v2 = vadd.f32 %v3927_v5, %v694_v62  ;;  %v1517_v59 = vld [vmem:[#allocation10 + $0x68] sm:$0xff] }
 0x1c1   : > { %v2584_v3 = vpop.f32.mrf.mxu0 }
 0x1c2   : > { %v760_v6 = vmul.f32 0.01, %v695_v2  ;;  %2705 = vmatmul.mubr.f32.gmra.mxu1 %v790_v1 }
 0x1c3   : > { %v699_v7 = vpop.f32.mrf.mxu0  ;;  %2707 = vmatprep.mubr.msk.f32.mxu1 %vm3545_vm0, %v3544_v0 }
 0x1c4   : > { %v791_v9 = vmax.f32 %v695_v2, %v760_v6  ;;  %v700_v10 = vadd.f32 %v3927_v5, %v699_v7  ;;  %v1516_v6 = vld [vmem:[#allocation10 + $0x60] sm:$0xff]  ;;  %v1515_v7 = vld [vmem:[#allocation10 + $0x58] sm:$0xff] }
 0x1c5   : > { %v2587_v11 = vpop.f32.mrf.mxu0 }
 0x1c6   : > { %v761_v12 = vmul.f32 0.01, %v700_v10  ;;  %2708 = vmatmul.mubr.f32.gmra.mxu1 %v791_v9 }
 0x1c7   : > { %v704_v13 = vpop.f32.mrf.mxu0  ;;  %2710 = vmatprep.mubr.msk.f32.mxu1 %vm3545_vm0, %v3544_v0 }
 0x1c8   : > { %v792_v14 = vmax.f32 %v700_v10, %v761_v12  ;;  %v705_v15 = vadd.f32 %v3927_v5, %v704_v13  ;;  %v1514_v10 = vld [vmem:[#allocation10 + $0x50] sm:$0xff] }
 0x1c9   : > { %v2590_v16 = vpop.f32.mrf.mxu0 }
 0x1ca   : > { %v762_v17 = vmul.f32 0.01, %v705_v15  ;;  %2711 = vmatmul.mubr.f32.gmra.mxu1 %v792_v14 }
 0x1cb   : > { %v709_v18 = vpop.f32.mrf.mxu0  ;;  %2713 = vmatprep.mubr.msk.f32.mxu1 %vm3545_vm0, %v3544_v0 }
 0x1cc   : > { %v793_v19 = vmax.f32 %v705_v15, %v762_v17  ;;  %v710_v20 = vadd.f32 %v3927_v5, %v709_v18  ;;  %v1513_v15 = vld [vmem:[#allocation10 + $0x48] sm:$0xff] }
 0x1cd   : > { %v2593_v21 = vpop.f32.mrf.mxu0 }
 0x1ce   : > { %v763_v22 = vmul.f32 0.01, %v710_v20  ;;  %2714 = vmatmul.mubr.f32.gmra.mxu1 %v793_v19  ;;  %v1512_v19 = vld [vmem:[#allocation10 + $0x40] sm:$0xff] }
 0x1cf   : > { %v714_v23 = vpop.f32.mrf.mxu0  ;;  %2716 = vmatprep.mubr.msk.f32.mxu1 %vm3545_vm0, %v3544_v0 }
 0x1d0   : > { %v794_v24 = vmax.f32 %v710_v20, %v763_v22  ;;  %v715_v25 = vadd.f32 %v3927_v5, %v714_v23 }
 0x1d1   : > { %v2596_v26 = vpop.f32.mrf.mxu0 }
 0x1d2   : > { %v764_v27 = vmul.f32 0.01, %v715_v25  ;;  %2717 = vmatmul.mubr.f32.gmra.mxu1 %v794_v24  ;;  %v1511_v24 = vld [vmem:[#allocation10 + $0x38] sm:$0xff] }
 0x1d3   : > { %v719_v28 = vpop.f32.mrf.mxu0  ;;  %2719 = vmatprep.mubr.msk.f32.mxu1 %vm3545_vm0, %v3544_v0 }
 0x1d4   : > { %v795_v29 = vmax.f32 %v715_v25, %v764_v27  ;;  %v720_v30 = vadd.f32 %v3927_v5, %v719_v28  ;;  %v1510_v28 = vld [vmem:[#allocation10 + $0x30] sm:$0xff] }
 0x1d5   : > { %v2599_v31 = vpop.f32.mrf.mxu0 }
 0x1d6   : > { %v765_v32 = vmul.f32 0.01, %v720_v30  ;;  %2720 = vmatmul.mubr.f32.gmra.mxu1 %v795_v29 }
 0x1d7   : > { %v724_v33 = vpop.f32.mrf.mxu0  ;;  %2722 = vmatprep.mubr.msk.f32.mxu1 %vm3545_vm0, %v3544_v0 }
 0x1d8   : > { %v796_v34 = vmax.f32 %v720_v30, %v765_v32  ;;  %v725_v35 = vadd.f32 %v3927_v5, %v724_v33  ;;  %v1509_v33 = vld [vmem:[#allocation10 + $0x28] sm:$0xff] }
 0x1d9   : > { %v2602_v36 = vpop.f32.mrf.mxu0 }
 0x1da   : > { %v766_v37 = vmul.f32 0.01, %v725_v35  ;;  %2723 = vmatmul.mubr.f32.gmra.mxu1 %v796_v34 }
 0x1db   : > { %v729_v38 = vpop.f32.mrf.mxu0  ;;  %2725 = vmatprep.mubr.msk.f32.mxu1 %vm3545_vm0, %v3544_v0 }
 0x1dc   : > { %v797_v39 = vmax.f32 %v725_v35, %v766_v37  ;;  %v730_v40 = vadd.f32 %v3927_v5, %v729_v38  ;;  %v1508_v37 = vld [vmem:[#allocation10 + $0x20] sm:$0xff] }
 0x1dd   : > { %v2605_v41 = vpop.f32.mrf.mxu0 }
 0x1de   : > { %v767_v42 = vmul.f32 0.01, %v730_v40  ;;  %2726 = vmatmul.mubr.f32.gmra.mxu1 %v797_v39 }
 0x1df   : > { %v734_v43 = vpop.f32.mrf.mxu0  ;;  %2728 = vmatprep.mubr.msk.f32.mxu1 %vm3545_vm0, %v3544_v0 }
 0x1e0   : > { %v798_v44 = vmax.f32 %v730_v40, %v767_v42  ;;  %v735_v45 = vadd.f32 %v3927_v5, %v734_v43  ;;  %v1518_v5 = vld [vmem:[#allocation10 + $0x70] sm:$0xff]  ;;  %v1507_v42 = vld [vmem:[#allocation10 + $0x18] sm:$0xff] }
 0x1e1   : > { %v2608_v46 = vpop.f32.mrf.mxu0  ;;  %2862 = vmatpush3.msra.mxu1 %v1518_v5 }
 0x1e2   : > { %v768_v47 = vmul.f32 0.01, %v735_v45  ;;  %2729 = vmatmul.mubr.f32.gmra.mxu1 %v798_v44  ;;  %2863 = vmatprep.subr.mxu1 %v3544_v0  ;;  %v1506_v46 = vld [vmem:[#allocation10 + $0x10] sm:$0xff] }
 0x1e3   : > { %2731 = vmatprep.mubr.msk.f32.mxu1 %vm3545_vm0, %v3544_v0  ;;  %2864 = vmatpush3.msra.mxu1 %v1517_v59 }
 0x1e4   : > { %v799_v48 = vmax.f32 %v735_v45, %v768_v47  ;;  %2865 = vmatprep.subr.mxu1 %v3544_v0 }
 0x1e5   : > { %2866 = vmatpush3.msra.mxu1 %v1516_v6 }
 0x1e6   : > { %2732 = vmatmul.mubr.f32.gmra.mxu1 %v799_v48  ;;  %2867 = vmatprep.subr.mxu1 %v3544_v0 }
 0x1e7   : > { %2891 = vmatprep.mubr.msk.f32.mxu1 %vm3545_vm0, %v3544_v0  ;;  %2868 = vmatpush3.msra.mxu1 %v1515_v7 }
 0x1e8   : > { %2869 = vmatprep.subr.mxu1 %v3544_v0 }
 0x1e9   : > { %2870 = vmatpush3.msra.mxu1 %v1514_v10 }
 0x1ea   : > { %2871 = vmatprep.subr.mxu1 %v3544_v0 }
 0x1eb   : > { %2872 = vmatpush3.msra.mxu1 %v1513_v15 }
 0x1ec   : > { %2873 = vmatprep.subr.mxu1 %v3544_v0 }
 0x1ed   : > { %2874 = vmatpush3.msra.mxu1 %v1512_v19 }
 0x1ee   : > { %2875 = vmatprep.subr.mxu1 %v3544_v0 }
 0x1ef   : > { %2876 = vmatpush3.msra.mxu1 %v1511_v24 }
 0x1f0   : > { %2877 = vmatprep.subr.mxu1 %v3544_v0 }
 0x1f1   : > { %2878 = vmatpush3.msra.mxu1 %v1510_v28 }
 0x1f2   : > { %2879 = vmatprep.subr.mxu1 %v3544_v0 }
 0x1f3   : > { %2880 = vmatpush3.msra.mxu1 %v1509_v33 }
 0x1f4   : > { %2881 = vmatprep.subr.mxu1 %v3544_v0 }
 0x1f5   : > { %2882 = vmatpush3.msra.mxu1 %v1508_v37 }
 0x1f6   : > { %2883 = vmatprep.subr.mxu1 %v3544_v0 }
 0x1f7   : > { %2884 = vmatpush3.msra.mxu1 %v1507_v42 }
 0x1f8   : > { %2885 = vmatprep.subr.mxu1 %v3544_v0 }
 0x1f9   : > { %2886 = vmatpush3.msra.mxu1 %v1506_v46 }
 0x1fa   : > { %2887 = vmatprep.subr.mxu1 %v3544_v0 }
 0x22e   : > { %v889_v51 = vpop.f32.mrf.mxu1 }
 0x22f   : > { %v890_v52 = vadd.f32 %v4038_v50, %v889_v51  ;;  %v1505_v51 = vld [vmem:[#allocation10 + $0x8] sm:$0xff] }
 0x230   : > { %v2643_v53 = vpop.f32.mrf.mxu1  ;;  %2888 = vmatpush3.msra.mxu1 %v1505_v51 }
 0x231   : > { %v1043_v54 = vmul.f32 0.5, %v890_v52  ;;  %2889 = vmatprep.subr.mxu1 %v3544_v0 }
 0x232   : > { %v894_v55 = vpop.f32.mrf.mxu1 }
 0x233   : > { %3139 = vtanh.f32 %v1043_v54  ;;  %v895_v56 = vadd.f32 %v4038_v50, %v894_v55 }
 0x234   : > { %v2646_v57 = vpop.f32.mrf.mxu1 }
 0x235   : > { %v1044_v58 = vmul.f32 0.5, %v895_v56 }
 0x236   : > { %v899_v60 = vpop.f32.mrf.mxu1 }
 0x237   : > { %3141 = vtanh.f32 %v1044_v58  ;;  %v900_v61 = vadd.f32 %v4038_v50, %v899_v60 }
 0x238   : > { %v2649_v62 = vpop.f32.mrf.mxu1 }
 0x239   : > { %v1045_v63 = vmul.f32 0.5, %v900_v61 }
 0x23a   : > { %v904_v1 = vpop.f32.mrf.mxu1 }
 0x23b   : > { %3143 = vtanh.f32 %v1045_v63  ;;  %v905_v2 = vadd.f32 %v4038_v50, %v904_v1 }
 0x23c   : > { %v2652_v3 = vpop.f32.mrf.mxu1 }
 0x23d   : > { %v1046_v4 = vmul.f32 0.5, %v905_v2 }
 0x23e   : > { %v909_v8 = vpop.f32.mrf.mxu1 }
 0x23f   : > { %3145 = vtanh.f32 %v1046_v4  ;;  %v910_v9 = vadd.f32 %v4038_v50, %v909_v8 }
 0x240   : > { %v3140_v11 = vpop.eup %3139  ;;  %v2655_v12 = vpop.f32.mrf.mxu1 }
 0x241   : > { %v1105_v13 = vmul.f32 0.5, %v3140_v11  ;;  %v1047_v14 = vmul.f32 0.5, %v910_v9 }
 0x242   : > { %v914_v16 = vpop.f32.mrf.mxu1 }
 0x243   : > { %v1136_v17 = vadd.f32 0.5, %v1105_v13  ;;  %3147 = vtanh.f32 %v1047_v14  ;;  %v915_v18 = vadd.f32 %v4038_v50, %v914_v16 }
 0x244   : > { %v3142_v20 = vpop.eup %3141  ;;  %v2658_v21 = vpop.f32.mrf.mxu1 }
 0x245   : > { %1168 = vst.msk [vmem:[%s4052_s20] sm:$0xff] %vm1167_vm1, %v1136_v17  ;;  %v1048_v22 = vmul.f32 0.5, %v915_v18  ;;  %2767 = vmatmul.mubr.f32.vlgmr.msra.gmra.mxu0 %v1136_v17  ;;  %v1106_v23 = vmul.f32 0.5, %v3142_v20 }
 0x246   : > { %v919_v25 = vpop.f32.mrf.mxu1  ;;  %2769 = vmatprep.mubr.msk.f32.mxu0 %vm3545_vm0, %v3544_v0 }
 0x247   : > { %3149 = vtanh.f32 %v1048_v22  ;;  %v920_v26 = vadd.f32 %v4038_v50, %v919_v25  ;;  %v1137_v27 = vadd.f32 0.5, %v1106_v23 }
 0x248   : > { %v3144_v29 = vpop.eup %3143  ;;  %v2661_v30 = vpop.f32.mrf.mxu1 }
 0x249   : > { %v1049_v31 = vmul.f32 0.5, %v920_v26  ;;  %1169 = vst.msk [vmem:[%s4052_s20 + $0x8] sm:$0xff] %vm1167_vm1, %v1137_v27  ;;  %2770 = vmatmul.mubr.f32.gmra.mxu0 %v1137_v27  ;;  %v1107_v32 = vmul.f32 0.5, %v3144_v29 }
 0x24a   : > { %v924_v34 = vpop.f32.mrf.mxu1  ;;  %2772 = vmatprep.mubr.msk.f32.mxu0 %vm3545_vm0, %v3544_v0 }
 0x24b   : > { %3151 = vtanh.f32 %v1049_v31  ;;  %v925_v35 = vadd.f32 %v4038_v50, %v924_v34  ;;  %v1138_v36 = vadd.f32 0.5, %v1107_v32 }
 0x24c   : > { %v3146_v38 = vpop.eup %3145  ;;  %v2664_v39 = vpop.f32.mrf.mxu1 }
 0x24d   : > { %v1050_v40 = vmul.f32 0.5, %v925_v35  ;;  %1170 = vst.msk [vmem:[%s4052_s20 + $0x10] sm:$0xff] %vm1167_vm1, %v1138_v36  ;;  %2773 = vmatmul.mubr.f32.gmra.mxu0 %v1138_v36  ;;  %v1108_v41 = vmul.f32 0.5, %v3146_v38 }
 0x24e   : > { %v929_v43 = vpop.f32.mrf.mxu1  ;;  %2775 = vmatprep.mubr.msk.f32.mxu0 %vm3545_vm0, %v3544_v0 }
 0x24f   : > { %3153 = vtanh.f32 %v1050_v40  ;;  %v930_v44 = vadd.f32 %v4038_v50, %v929_v43  ;;  %v1139_v45 = vadd.f32 0.5, %v1108_v41 }
 0x250   : > { %v3148_v47 = vpop.eup %3147  ;;  %v2667_v48 = vpop.f32.mrf.mxu1 }
 0x251   : > { %v1051_v49 = vmul.f32 0.5, %v930_v44  ;;  %1171 = vst.msk [vmem:[%s4052_s20 + $0x18] sm:$0xff] %vm1167_vm1, %v1139_v45  ;;  %2776 = vmatmul.mubr.f32.gmra.mxu0 %v1139_v45  ;;  %v1109_v5 = vmul.f32 0.5, %v3148_v47 }
 0x252   : > { %v934_v52 = vpop.f32.mrf.mxu1  ;;  %2778 = vmatprep.mubr.msk.f32.mxu0 %vm3545_vm0, %v3544_v0 }
 0x253   : > { %3155 = vtanh.f32 %v1051_v49  ;;  %v935_v53 = vadd.f32 %v4038_v50, %v934_v52  ;;  %v1140_v54 = vadd.f32 0.5, %v1109_v5 }
 0x254   : > { %v3150_v55 = vpop.eup %3149  ;;  %v2670_v56 = vpop.f32.mrf.mxu1 }
 0x255   : > { %v1052_v57 = vmul.f32 0.5, %v935_v53  ;;  %1172 = vst.msk [vmem:[%s4052_s20 + $0x20] sm:$0xff] %vm1167_vm1, %v1140_v54  ;;  %2779 = vmatmul.mubr.f32.gmra.mxu0 %v1140_v54  ;;  %v1110_v58 = vmul.f32 0.5, %v3150_v55 }
 0x256   : > { %v939_v59 = vpop.f32.mrf.mxu1  ;;  %2781 = vmatprep.mubr.msk.f32.mxu0 %vm3545_vm0, %v3544_v0 }
 0x257   : > { %3157 = vtanh.f32 %v1052_v57  ;;  %v940_v60 = vadd.f32 %v4038_v50, %v939_v59  ;;  %v1141_v61 = vadd.f32 0.5, %v1110_v58 }
 0x258   : > { %v3152_v62 = vpop.eup %3151  ;;  %v2673_v63 = vpop.f32.mrf.mxu1 }
 0x259   : > { %v1053_v1 = vmul.f32 0.5, %v940_v60  ;;  %1173 = vst.msk [vmem:[%s4052_s20 + $0x28] sm:$0xff] %vm1167_vm1, %v1141_v61  ;;  %2782 = vmatmul.mubr.f32.gmra.mxu0 %v1141_v61  ;;  %v1111_v2 = vmul.f32 0.5, %v3152_v62 }
 0x25a   : > { %v944_v3 = vpop.f32.mrf.mxu1  ;;  %2784 = vmatprep.mubr.msk.f32.mxu0 %vm3545_vm0, %v3544_v0 }
 0x25b   : > { %3159 = vtanh.f32 %v1053_v1  ;;  %v945_v4 = vadd.f32 %v4038_v50, %v944_v3  ;;  %v1142_v6 = vadd.f32 0.5, %v1111_v2 }
 0x25c   : > { %v3154_v7 = vpop.eup %3153  ;;  %v2676_v8 = vpop.f32.mrf.mxu1 }
 0x25d   : > { %v1054_v9 = vmul.f32 0.5, %v945_v4  ;;  %1174 = vst.msk [vmem:[%s4052_s20 + $0x30] sm:$0xff] %vm1167_vm1, %v1142_v6  ;;  %2785 = vmatmul.mubr.f32.gmra.mxu0 %v1142_v6  ;;  %v1112_v10 = vmul.f32 0.5, %v3154_v7 }
 0x25e   : > { %v949_v11 = vpop.f32.mrf.mxu1  ;;  %2787 = vmatprep.mubr.msk.f32.mxu0 %vm3545_vm0, %v3544_v0 }
 0x25f   : > { %3161 = vtanh.f32 %v1054_v9  ;;  %v950_v12 = vadd.f32 %v4038_v50, %v949_v11  ;;  %v1143_v13 = vadd.f32 0.5, %v1112_v10 }
 0x260   : > { %v3156_v14 = vpop.eup %3155  ;;  %v2679_v15 = vpop.f32.mrf.mxu1 }
 0x261   : > { %v1055_v16 = vmul.f32 0.5, %v950_v12  ;;  %1175 = vst.msk [vmem:[%s4052_s20 + $0x38] sm:$0xff] %vm1167_vm1, %v1143_v13  ;;  %2788 = vmatmul.mubr.f32.gmra.mxu0 %v1143_v13  ;;  %v1113_v17 = vmul.f32 0.5, %v3156_v14 }
 0x262   : > { %v954_v18 = vpop.f32.mrf.mxu1  ;;  %2790 = vmatprep.mubr.msk.f32.mxu0 %vm3545_vm0, %v3544_v0 }
 0x263   : > { %3163 = vtanh.f32 %v1055_v16  ;;  %v955_v19 = vadd.f32 %v4038_v50, %v954_v18  ;;  %v1144_v20 = vadd.f32 0.5, %v1113_v17 }
 0x264   : > { %v3158_v21 = vpop.eup %3157  ;;  %v2682_v22 = vpop.f32.mrf.mxu1 }
 0x265   : > { %v1056_v23 = vmul.f32 0.5, %v955_v19  ;;  %1176 = vst.msk [vmem:[%s4052_s20 + $0x40] sm:$0xff] %vm1167_vm1, %v1144_v20  ;;  %2791 = vmatmul.mubr.f32.gmra.mxu0 %v1144_v20  ;;  %v1114_v24 = vmul.f32 0.5, %v3158_v21 }
 0x266   : > { %v959_v25 = vpop.f32.mrf.mxu1  ;;  %2793 = vmatprep.mubr.msk.f32.mxu0 %vm3545_vm0, %v3544_v0 }
 0x267   : > { %3165 = vtanh.f32 %v1056_v23  ;;  %v960_v26 = vadd.f32 %v4038_v50, %v959_v25  ;;  %v1145_v27 = vadd.f32 0.5, %v1114_v24 }
 0x268   : > { %v3160_v28 = vpop.eup %3159  ;;  %v2685_v29 = vpop.f32.mrf.mxu1 }
 0x269   : > { %v1057_v30 = vmul.f32 0.5, %v960_v26  ;;  %1177 = vst.msk [vmem:[%s4052_s20 + $0x48] sm:$0xff] %vm1167_vm1, %v1145_v27  ;;  %2794 = vmatmul.mubr.f32.gmra.mxu0 %v1145_v27  ;;  %v1115_v31 = vmul.f32 0.5, %v3160_v28  ;;  %v1504_v27 = vld [vmem:[#allocation10] sm:$0xff] }
 0x26a   : > { %v964_v32 = vpop.f32.mrf.mxu1  ;;  %2796 = vmatprep.mubr.msk.f32.mxu0 %vm3545_vm0, %v3544_v0  ;;  %2890 = vmatpush3.msra.mxu1 %v1504_v27 }
 0x26b   : > { %3167 = vtanh.f32 %v1057_v30  ;;  %v965_v33 = vadd.f32 %v4038_v50, %v964_v32  ;;  %v1146_v34 = vadd.f32 0.5, %v1115_v31 }
 0x26c   : > { %v3162_v35 = vpop.eup %3161  ;;  %v2688_v36 = vpop.f32.mrf.mxu1 }
 0x26d   : > { %v1058_v37 = vmul.f32 0.5, %v965_v33  ;;  %1178 = vst.msk [vmem:[%s4052_s20 + $0x50] sm:$0xff] %vm1167_vm1, %v1146_v34  ;;  %2797 = vmatmul.mubr.f32.gmra.mxu0 %v1146_v34  ;;  %v1116_v38 = vmul.f32 0.5, %v3162_v35 }
 0x26e   : > { %v969_v39 = vpop.f32.mrf.mxu1  ;;  %2799 = vmatprep.mubr.msk.f32.mxu0 %vm3545_vm0, %v3544_v0 }
 0x26f   : > { %3169 = vtanh.f32 %v1058_v37  ;;  %v970_v40 = vadd.f32 %v4038_v50, %v969_v39  ;;  %v1147_v41 = vadd.f32 0.5, %v1116_v38 }
 0x270   : > { %v3164_v42 = vpop.eup %3163  ;;  %v2691_v43 = vpop.f32.mrf.mxu1 }
 0x271   : > { %v1059_v44 = vmul.f32 0.5, %v970_v40  ;;  %1179 = vst.msk [vmem:[%s4052_s20 + $0x58] sm:$0xff] %vm1167_vm1, %v1147_v41  ;;  %2800 = vmatmul.mubr.f32.gmra.mxu0 %v1147_v41  ;;  %v1117_v45 = vmul.f32 0.5, %v3164_v42 }
 0x272   : > { %v974_v46 = vpop.f32.mrf.mxu1  ;;  %2802 = vmatprep.mubr.msk.f32.mxu0 %vm3545_vm0, %v3544_v0 }
 0x273   : > { %3171 = vtanh.f32 %v1059_v44  ;;  %v975_v47 = vadd.f32 %v4038_v50, %v974_v46  ;;  %v1148_v48 = vadd.f32 0.5, %v1117_v45 }
 0x274   : > { %v3166_v49 = vpop.eup %3165  ;;  %v2694_v5 = vpop.f32.mrf.mxu1 }
 0x275   : > { %v1060_v51 = vmul.f32 0.5, %v975_v47  ;;  %1180 = vst.msk [vmem:[%s4052_s20 + $0x60] sm:$0xff] %vm1167_vm1, %v1148_v48  ;;  %2803 = vmatmul.mubr.f32.gmra.mxu0 %v1148_v48  ;;  %v1118_v52 = vmul.f32 0.5, %v3166_v49 }
 0x276   : > { %v979_v53 = vpop.f32.mrf.mxu1  ;;  %2805 = vmatprep.mubr.msk.f32.mxu0 %vm3545_vm0, %v3544_v0 }
 0x277   : > { %3173 = vtanh.f32 %v1060_v51  ;;  %v980_v54 = vadd.f32 %v4038_v50, %v979_v53  ;;  %v1149_v55 = vadd.f32 0.5, %v1118_v52 }
 0x278   : > { %v3168_v56 = vpop.eup %3167  ;;  %v2697_v57 = vpop.f32.mrf.mxu1 }
 0x279   : > { %v1061_v58 = vmul.f32 0.5, %v980_v54  ;;  %1181 = vst.msk [vmem:[%s4052_s20 + $0x68] sm:$0xff] %vm1167_vm1, %v1149_v55  ;;  %2806 = vmatmul.mubr.f32.gmra.mxu0 %v1149_v55  ;;  %v1119_v59 = vmul.f32 0.5, %v3168_v56 }
 0x27a   : > { %v984_v60 = vpop.f32.mrf.mxu1  ;;  %2808 = vmatprep.mubr.msk.f32.mxu0 %vm3545_vm0, %v3544_v0 }
 0x27b   : > { %3175 = vtanh.f32 %v1061_v58  ;;  %v985_v61 = vadd.f32 %v4038_v50, %v984_v60  ;;  %v1150_v62 = vadd.f32 0.5, %v1119_v59 }
 0x27c   : > { %v3170_v63 = vpop.eup %3169  ;;  %v2700_v1 = vpop.f32.mrf.mxu1 }
 0x27d   : > { %v1062_v2 = vmul.f32 0.5, %v985_v61  ;;  %1182 = vst.msk [vmem:[%s4052_s20 + $0x70] sm:$0xff] %vm1167_vm1, %v1150_v62  ;;  %2809 = vmatmul.mubr.f32.gmra.mxu0 %v1150_v62  ;;  %v1120_v3 = vmul.f32 0.5, %v3170_v63 }
 0x27e   : > { %v989_v4 = vpop.f32.mrf.mxu1  ;;  %2811 = vmatprep.mubr.msk.f32.mxu0 %vm3545_vm0, %v3544_v0 }
 0x27f   : > { %3177 = vtanh.f32 %v1062_v2  ;;  %v990_v6 = vadd.f32 %v4038_v50, %v989_v4  ;;  %v1151_v7 = vadd.f32 0.5, %v1120_v3 }
 0x280   : > { %v3172_v8 = vpop.eup %3171  ;;  %v2703_v9 = vpop.f32.mrf.mxu1 }
 0x281   : > { %v1063_v10 = vmul.f32 0.5, %v990_v6  ;;  %1183 = vst.msk [vmem:[%s4052_s20 + $0x78] sm:$0xff] %vm1167_vm1, %v1151_v7  ;;  %2812 = vmatmul.mubr.f32.gmra.mxu0 %v1151_v7  ;;  %v1121_v11 = vmul.f32 0.5, %v3172_v8 }
 0x282   : > { %v994_v12 = vpop.f32.mrf.mxu1  ;;  %2814 = vmatprep.mubr.msk.f32.mxu0 %vm3545_vm0, %v3544_v0 }
 0x283   : > { %3179 = vtanh.f32 %v1063_v10  ;;  %v995_v13 = vadd.f32 %v4038_v50, %v994_v12  ;;  %v1152_v14 = vadd.f32 0.5, %v1121_v11 }
 0x284   : > { %v3174_v15 = vpop.eup %3173  ;;  %v2706_v16 = vpop.f32.mrf.mxu1 }
 0x285   : > { %v1064_v17 = vmul.f32 0.5, %v995_v13  ;;  %1184 = vst.msk [vmem:[%s4052_s20 + $0x80] sm:$0xff] %vm1167_vm1, %v1152_v14  ;;  %2815 = vmatmul.mubr.f32.gmra.mxu0 %v1152_v14  ;;  %v1122_v18 = vmul.f32 0.5, %v3174_v15 }
 0x286   : > { %v999_v19 = vpop.f32.mrf.mxu1  ;;  %2817 = vmatprep.mubr.msk.f32.mxu0 %vm3545_vm0, %v3544_v0 }
 0x287   : > { %3181 = vtanh.f32 %v1064_v17  ;;  %v1000_v20 = vadd.f32 %v4038_v50, %v999_v19  ;;  %v1153_v21 = vadd.f32 0.5, %v1122_v18 }
 0x288   : > { %v3176_v22 = vpop.eup %3175  ;;  %v2709_v23 = vpop.f32.mrf.mxu1 }
 0x289   : > { %v1065_v24 = vmul.f32 0.5, %v1000_v20  ;;  %1185 = vst.msk [vmem:[%s4052_s20 + $0x88] sm:$0xff] %vm1167_vm1, %v1153_v21  ;;  %2818 = vmatmul.mubr.f32.gmra.mxu0 %v1153_v21  ;;  %v1123_v25 = vmul.f32 0.5, %v3176_v22 }
 0x28a   : > { %v1004_v26 = vpop.f32.mrf.mxu1  ;;  %2820 = vmatprep.mubr.msk.f32.mxu0 %vm3545_vm0, %v3544_v0 }
 0x28b   : > { %3183 = vtanh.f32 %v1065_v24  ;;  %v1005_v28 = vadd.f32 %v4038_v50, %v1004_v26  ;;  %v1154_v29 = vadd.f32 0.5, %v1123_v25 }
 0x28c   : > { %v3178_v30 = vpop.eup %3177  ;;  %v2712_v31 = vpop.f32.mrf.mxu1 }
 0x28d   : > { %v1066_v32 = vmul.f32 0.5, %v1005_v28  ;;  %1186 = vst.msk [vmem:[%s4052_s20 + $0x90] sm:$0xff] %vm1167_vm1, %v1154_v29  ;;  %2821 = vmatmul.mubr.f32.gmra.mxu0 %v1154_v29  ;;  %v1124_v33 = vmul.f32 0.5, %v3178_v30 }
 0x28e   : > { %v1009_v34 = vpop.f32.mrf.mxu1  ;;  %2823 = vmatprep.mubr.msk.f32.mxu0 %vm3545_vm0, %v3544_v0 }
 0x28f   : > { %3185 = vtanh.f32 %v1066_v32  ;;  %v1010_v35 = vadd.f32 %v4038_v50, %v1009_v34  ;;  %v1155_v36 = vadd.f32 0.5, %v1124_v33  ;;  %v4213_v33 = vld [vmem:[%s4562_s6] ss:$0 sm:$0xff] }
 0x290   : > { %v3180_v37 = vpop.eup %3179  ;;  %v2715_v38 = vpop.f32.mrf.mxu1 }
 0x291   : > { %v1067_v39 = vmul.f32 0.5, %v1010_v35  ;;  %1187 = vst.msk [vmem:[%s4052_s20 + $0x98] sm:$0xff] %vm1167_vm1, %v1155_v36  ;;  %2824 = vmatmul.mubr.f32.gmra.mxu0 %v1155_v36  ;;  %v1125_v40 = vmul.f32 0.5, %v3180_v37 }
 0x292   : > { %v1014_v41 = vpop.f32.mrf.mxu1  ;;  %2826 = vmatprep.mubr.msk.f32.mxu0 %vm3545_vm0, %v3544_v0 }
 0x293   : > { %3187 = vtanh.f32 %v1067_v39  ;;  %v1015_v42 = vadd.f32 %v4038_v50, %v1014_v41  ;;  %v1156_v43 = vadd.f32 0.5, %v1125_v40 }
 0x294   : > { %v3182_v44 = vpop.eup %3181  ;;  %v2718_v45 = vpop.f32.mrf.mxu1 }
 0x295   : > { %v1068_v46 = vmul.f32 0.5, %v1015_v42  ;;  %1188 = vst.msk [vmem:[%s4052_s20 + $0xa0] sm:$0xff] %vm1167_vm1, %v1156_v43  ;;  %2827 = vmatmul.mubr.f32.gmra.mxu0 %v1156_v43  ;;  %v1126_v47 = vmul.f32 0.5, %v3182_v44 }
 0x296   : > { %v1019_v48 = vpop.f32.mrf.mxu1  ;;  %2829 = vmatprep.mubr.msk.f32.mxu0 %vm3545_vm0, %v3544_v0 }
 0x297   : > { %3189 = vtanh.f32 %v1068_v46  ;;  %v1020_v49 = vadd.f32 %v4038_v50, %v1019_v48  ;;  %v1157_v5 = vadd.f32 0.5, %v1126_v47 }
 0x298   : > { %v3184_v51 = vpop.eup %3183  ;;  %v2721_v52 = vpop.f32.mrf.mxu1 }
 0x299   : > { %v1069_v53 = vmul.f32 0.5, %v1020_v49  ;;  %1189 = vst.msk [vmem:[%s4052_s20 + $0xa8] sm:$0xff] %vm1167_vm1, %v1157_v5  ;;  %2830 = vmatmul.mubr.f32.gmra.mxu0 %v1157_v5  ;;  %v1127_v54 = vmul.f32 0.5, %v3184_v51 }
 0x29a   : > { %v1024_v55 = vpop.f32.mrf.mxu1  ;;  %2832 = vmatprep.mubr.msk.f32.mxu0 %vm3545_vm0, %v3544_v0 }
 0x29b   : > { %3191 = vtanh.f32 %v1069_v53  ;;  %v1025_v56 = vadd.f32 %v4038_v50, %v1024_v55  ;;  %v1158_v57 = vadd.f32 0.5, %v1127_v54 }
 0x29c   : > { %v3186_v58 = vpop.eup %3185  ;;  %v2724_v59 = vpop.f32.mrf.mxu1 }
 0x29d   : > { %v1070_v60 = vmul.f32 0.5, %v1025_v56  ;;  %1190 = vst.msk [vmem:[%s4052_s20 + $0xb0] sm:$0xff] %vm1167_vm1, %v1158_v57  ;;  %2833 = vmatmul.mubr.f32.gmra.mxu0 %v1158_v57  ;;  %v1128_v61 = vmul.f32 0.5, %v3186_v58 }
 0x29e   : > { %v1029_v62 = vpop.f32.mrf.mxu1  ;;  %2835 = vmatprep.mubr.msk.f32.mxu0 %vm3545_vm0, %v3544_v0 }
 0x29f   : > { %3193 = vtanh.f32 %v1070_v60  ;;  %v1030_v63 = vadd.f32 %v4038_v50, %v1029_v62  ;;  %v1159_v1 = vadd.f32 0.5, %v1128_v61 }
 0x2a0   : > { %v3188_v2 = vpop.eup %3187  ;;  %v2727_v3 = vpop.f32.mrf.mxu1 }
 0x2a1   : > { %v1071_v4 = vmul.f32 0.5, %v1030_v63  ;;  %1191 = vst.msk [vmem:[%s4052_s20 + $0xb8] sm:$0xff] %vm1167_vm1, %v1159_v1  ;;  %2836 = vmatmul.mubr.f32.gmra.mxu0 %v1159_v1  ;;  %v1129_v6 = vmul.f32 0.5, %v3188_v2 }
 0x2a2   : > { %v1034_v7 = vpop.f32.mrf.mxu1  ;;  %2838 = vmatprep.mubr.msk.f32.mxu0 %vm3545_vm0, %v3544_v0 }
 0x2a3   : > { %3195 = vtanh.f32 %v1071_v4  ;;  %v1035_v8 = vadd.f32 %v4038_v50, %v1034_v7  ;;  %v1160_v9 = vadd.f32 0.5, %v1129_v6 }
 0x2a4   : > { %v3190_v10 = vpop.eup %3189  ;;  %v2730_v11 = vpop.f32.mrf.mxu1 }
 0x2a5   : > { %v1130_v12 = vmul.f32 0.5, %v3190_v10  ;;  %v1072_v13 = vmul.f32 0.5, %v1035_v8  ;;  %1192 = vst.msk [vmem:[%s4052_s20 + $0xc0] sm:$0xff] %vm1167_vm1, %v1160_v9  ;;  %2839 = vmatmul.mubr.f32.gmra.mxu0 %v1160_v9 }
 0x2a6   : > { %v1039_v14 = vpop.f32.mrf.mxu1  ;;  %2841 = vmatprep.mubr.msk.f32.mxu0 %vm3545_vm0, %v3544_v0 }
 0x2a7   : > { %v1161_v15 = vadd.f32 0.5, %v1130_v12  ;;  %3197 = vtanh.f32 %v1072_v13  ;;  %v1040_v16 = vadd.f32 %v4038_v50, %v1039_v14 }
 0x2a8   : > { %v3192_v17 = vpop.eup %3191  ;;  %v2733_v18 = vpop.f32.mrf.mxu1 }
 0x2a9   : > { %1193 = vst.msk [vmem:[%s4052_s20 + $0xc8] sm:$0xff] %vm1167_vm1, %v1161_v15  ;;  %v1131_v19 = vmul.f32 0.5, %v3192_v17  ;;  %v1073_v20 = vmul.f32 0.5, %v1040_v16  ;;  %2842 = vmatmul.mubr.f32.gmra.mxu0 %v1161_v15 }
 0x2aa   : > { %2844 = vmatprep.mubr.msk.f32.mxu0 %vm3545_vm0, %v3544_v0 }
 0x2ab   : > { %v1162_v21 = vadd.f32 0.5, %v1131_v19  ;;  %3199 = vtanh.f32 %v1073_v20 }
 0x2ac   : > { %v3194_v22 = vpop.eup %3193 }
 0x2ad   : > { %1194 = vst.msk [vmem:[%s4052_s20 + $0xd0] sm:$0xff] %vm1167_vm1, %v1162_v21  ;;  %v1132_v23 = vmul.f32 0.5, %v3194_v22  ;;  %2845 = vmatmul.mubr.f32.gmra.mxu0 %v1162_v21 }
 0x2ae   : > { %2847 = vmatprep.mubr.msk.f32.mxu0 %vm3545_vm0, %v3544_v0 }
 0x2af   : > { %v1163_v50 = vadd.f32 0.5, %v1132_v23 }
 0x2b0   : > { %v3196_v24 = vpop.eup %3195 }
 0x2b1   : > { %1195 = vst.msk [vmem:[%s4052_s20 + $0xd8] sm:$0xff] %vm1167_vm1, %v1163_v50  ;;  %v1133_v25 = vmul.f32 0.5, %v3196_v24  ;;  %2848 = vmatmul.mubr.f32.gmra.mxu0 %v1163_v50 }
 0x2b2   : > { %2850 = vmatprep.mubr.msk.f32.mxu0 %vm3545_vm0, %v3544_v0 }
 0x2b3   : > { %v1164_v26 = vadd.f32 0.5, %v1133_v25 }
 0x2b4   : > { %v3198_v27 = vpop.eup %3197 }
 0x2b5   : > { %1196 = vst.msk [vmem:[%s4052_s20 + $0xe0] sm:$0xff] %vm1167_vm1, %v1164_v26  ;;  %v1134_v28 = vmul.f32 0.5, %v3198_v27  ;;  %2851 = vmatmul.mubr.f32.gmra.mxu0 %v1164_v26 }
 0x2b6   : > { %2853 = vmatprep.mubr.msk.f32.mxu0 %vm3545_vm0, %v3544_v0 }
 0x2b7   : > { %v1165_v29 = vadd.f32 0.5, %v1134_v28 }
 0x2b8   : > { %v3200_v30 = vpop.eup %3199 }
 0x2b9   : > { %1197 = vst.msk [vmem:[%s4052_s20 + $0xe8] sm:$0xff] %vm1167_vm1, %v1165_v29  ;;  %v1135_v31 = vmul.f32 0.5, %v3200_v30  ;;  %2854 = vmatmul.mubr.f32.gmra.mxu0 %v1165_v29 }
 0x2ba   : > { %2856 = vmatprep.mubr.msk.f32.mxu0 %vm3545_vm0, %v3544_v0 }
 0x2bb   : > { %v1166_v32 = vadd.f32 0.5, %v1135_v31 }
 0x2bd   : > { %1198 = vst.msk [vmem:[%s4052_s20 + $0xf0] sm:$0xff] %vm1167_vm1, %v1166_v32  ;;  %2857 = vmatmul.mubr.f32.gmra.mxu0 %v1166_v32 }
 0x305   : > { %v1288_v34 = vpop.f32.mrf.mxu0 }
 0x306   : > { %v1289_v35 = vadd.f32 %v4213_v33, %v1288_v34 }
 0x307   : > { %v2768_v36 = vpop.f32.mrf.mxu0 }
 0x308   : > { %v1442_v37 = vmul.f32 0.01, %v1289_v35 }
 0x309   : > { %v1293_v38 = vpop.f32.mrf.mxu0 }
 0x30a   : > { %v1473_v39 = vmax.f32 %v1289_v35, %v1442_v37  ;;  %v1294_v40 = vadd.f32 %v4213_v33, %v1293_v38 }
 0x30b   : > { %v2771_v41 = vpop.f32.mrf.mxu0 }
 0x30c   : > { %v1443_v42 = vmul.f32 0.01, %v1294_v40  ;;  %2892 = vmatmul.mubr.f32.vlgmr.msra.gmra.mxu1 %v1473_v39 }
 0x30d   : > { %v1298_v43 = vpop.f32.mrf.mxu0  ;;  %2894 = vmatprep.mubr.msk.f32.mxu1 %vm3545_vm0, %v3544_v0 }
 0x30e   : > { %v1474_v44 = vmax.f32 %v1294_v40, %v1443_v42  ;;  %v1299_v45 = vadd.f32 %v4213_v33, %v1298_v43 }
 0x30f   : > { %v2774_v46 = vpop.f32.mrf.mxu0 }
 0x310   : > { %v1444_v47 = vmul.f32 0.01, %v1299_v45  ;;  %2895 = vmatmul.mubr.f32.gmra.mxu1 %v1474_v44 }
 0x311   : > { %v1303_v48 = vpop.f32.mrf.mxu0  ;;  %2897 = vmatprep.mubr.msk.f32.mxu1 %vm3545_vm0, %v3544_v0 }
 0x312   : > { %v1475_v49 = vmax.f32 %v1299_v45, %v1444_v47  ;;  %v1304_v5 = vadd.f32 %v4213_v33, %v1303_v48 }
 0x313   : > { %v2777_v51 = vpop.f32.mrf.mxu0 }
 0x314   : > { %v1445_v52 = vmul.f32 0.01, %v1304_v5  ;;  %2898 = vmatmul.mubr.f32.gmra.mxu1 %v1475_v49 }
 0x315   : > { %v1308_v53 = vpop.f32.mrf.mxu0  ;;  %2900 = vmatprep.mubr.msk.f32.mxu1 %vm3545_vm0, %v3544_v0 }
 0x316   : > { %v1476_v54 = vmax.f32 %v1304_v5, %v1445_v52  ;;  %v1309_v55 = vadd.f32 %v4213_v33, %v1308_v53 }
 0x317   : > { %v2780_v56 = vpop.f32.mrf.mxu0 }
 0x318   : > { %v1446_v57 = vmul.f32 0.01, %v1309_v55  ;;  %2901 = vmatmul.mubr.f32.gmra.mxu1 %v1476_v54 }
 0x319   : > { %v1313_v58 = vpop.f32.mrf.mxu0  ;;  %2903 = vmatprep.mubr.msk.f32.mxu1 %vm3545_vm0, %v3544_v0 }
 0x31a   : > { %v1477_v59 = vmax.f32 %v1309_v55, %v1446_v57  ;;  %v1314_v60 = vadd.f32 %v4213_v33, %v1313_v58 }
 0x31b   : > { %v2783_v61 = vpop.f32.mrf.mxu0 }
 0x31c   : > { %v1447_v62 = vmul.f32 0.01, %v1314_v60  ;;  %2904 = vmatmul.mubr.f32.gmra.mxu1 %v1477_v59 }
 0x31d   : > { %v1318_v63 = vpop.f32.mrf.mxu0  ;;  %2906 = vmatprep.mubr.msk.f32.mxu1 %vm3545_vm0, %v3544_v0 }
 0x31e   : > { %v1478_v1 = vmax.f32 %v1314_v60, %v1447_v62  ;;  %v1319_v2 = vadd.f32 %v4213_v33, %v1318_v63 }
 0x31f   : > { %v2786_v3 = vpop.f32.mrf.mxu0 }
 0x320   : > { %v1448_v4 = vmul.f32 0.01, %v1319_v2  ;;  %2907 = vmatmul.mubr.f32.gmra.mxu1 %v1478_v1 }
 0x321   : > { %v1323_v6 = vpop.f32.mrf.mxu0  ;;  %2909 = vmatprep.mubr.msk.f32.mxu1 %vm3545_vm0, %v3544_v0 }
 0x322   : > { %v1479_v7 = vmax.f32 %v1319_v2, %v1448_v4  ;;  %v1324_v8 = vadd.f32 %v4213_v33, %v1323_v6 }
 0x323   : > { %v2789_v9 = vpop.f32.mrf.mxu0 }
 0x324   : > { %v1449_v10 = vmul.f32 0.01, %v1324_v8  ;;  %2910 = vmatmul.mubr.f32.gmra.mxu1 %v1479_v7 }
 0x325   : > { %v1328_v11 = vpop.f32.mrf.mxu0  ;;  %2912 = vmatprep.mubr.msk.f32.mxu1 %vm3545_vm0, %v3544_v0 }
 0x326   : > { %v1480_v12 = vmax.f32 %v1324_v8, %v1449_v10  ;;  %v1329_v13 = vadd.f32 %v4213_v33, %v1328_v11 }
 0x327   : > { %v2792_v14 = vpop.f32.mrf.mxu0 }
 0x328   : > { %v1450_v15 = vmul.f32 0.01, %v1329_v13  ;;  %2913 = vmatmul.mubr.f32.gmra.mxu1 %v1480_v12 }
 0x329   : > { %v1333_v16 = vpop.f32.mrf.mxu0  ;;  %2915 = vmatprep.mubr.msk.f32.mxu1 %vm3545_vm0, %v3544_v0 }
 0x32a   : > { %v1481_v17 = vmax.f32 %v1329_v13, %v1450_v15  ;;  %v1334_v18 = vadd.f32 %v4213_v33, %v1333_v16 }
 0x32b   : > { %v2795_v19 = vpop.f32.mrf.mxu0 }
 0x32c   : > { %v1451_v20 = vmul.f32 0.01, %v1334_v18  ;;  %2916 = vmatmul.mubr.f32.gmra.mxu1 %v1481_v17 }
 0x32d   : > { %v1338_v21 = vpop.f32.mrf.mxu0  ;;  %2918 = vmatprep.mubr.msk.f32.mxu1 %vm3545_vm0, %v3544_v0 }
 0x32e   : > { %v1482_v22 = vmax.f32 %v1334_v18, %v1451_v20  ;;  %v1339_v23 = vadd.f32 %v4213_v33, %v1338_v21 }
 0x32f   : > { %v2798_v50 = vpop.f32.mrf.mxu0 }
 0x330   : > { %v1452_v24 = vmul.f32 0.01, %v1339_v23  ;;  %2919 = vmatmul.mubr.f32.gmra.mxu1 %v1482_v22 }
 0x331   : > { %v1343_v25 = vpop.f32.mrf.mxu0  ;;  %2921 = vmatprep.mubr.msk.f32.mxu1 %vm3545_vm0, %v3544_v0 }
 0x332   : > { %v1483_v26 = vmax.f32 %v1339_v23, %v1452_v24  ;;  %v1344_v27 = vadd.f32 %v4213_v33, %v1343_v25 }
 0x333   : > { %v2801_v28 = vpop.f32.mrf.mxu0 }
 0x334   : > { %v1453_v29 = vmul.f32 0.01, %v1344_v27  ;;  %2922 = vmatmul.mubr.f32.gmra.mxu1 %v1483_v26 }
 0x335   : > { %v1348_v30 = vpop.f32.mrf.mxu0  ;;  %2924 = vmatprep.mubr.msk.f32.mxu1 %vm3545_vm0, %v3544_v0 }
 0x336   : > { %v1484_v31 = vmax.f32 %v1344_v27, %v1453_v29  ;;  %v1349_v32 = vadd.f32 %v4213_v33, %v1348_v30 }
 0x337   : > { %v2804_v34 = vpop.f32.mrf.mxu0 }
 0x338   : > { %v1454_v35 = vmul.f32 0.01, %v1349_v32  ;;  %2925 = vmatmul.mubr.f32.gmra.mxu1 %v1484_v31 }
 0x339   : > { %v1353_v36 = vpop.f32.mrf.mxu0  ;;  %2927 = vmatprep.mubr.msk.f32.mxu1 %vm3545_vm0, %v3544_v0 }
 0x33a   : > { %v1485_v37 = vmax.f32 %v1349_v32, %v1454_v35  ;;  %v1354_v38 = vadd.f32 %v4213_v33, %v1353_v36 }
 0x33b   : > { %v2807_v39 = vpop.f32.mrf.mxu0 }
 0x33c   : > { %v1455_v40 = vmul.f32 0.01, %v1354_v38  ;;  %2928 = vmatmul.mubr.f32.gmra.mxu1 %v1485_v37 }
 0x33d   : > { %v1358_v41 = vpop.f32.mrf.mxu0  ;;  %2930 = vmatprep.mubr.msk.f32.mxu1 %vm3545_vm0, %v3544_v0 }
 0x33e   : > { %v1486_v42 = vmax.f32 %v1354_v38, %v1455_v40  ;;  %v1359_v43 = vadd.f32 %v4213_v33, %v1358_v41 }
 0x33f   : > { %v2810_v44 = vpop.f32.mrf.mxu0 }
 0x340   : > { %v1456_v45 = vmul.f32 0.01, %v1359_v43  ;;  %2931 = vmatmul.mubr.f32.gmra.mxu1 %v1486_v42 }
 0x341   : > { %v1363_v46 = vpop.f32.mrf.mxu0  ;;  %2933 = vmatprep.mubr.msk.f32.mxu1 %vm3545_vm0, %v3544_v0 }
 0x342   : > { %v1487_v47 = vmax.f32 %v1359_v43, %v1456_v45  ;;  %v1364_v48 = vadd.f32 %v4213_v33, %v1363_v46 }
 0x343   : > { %v2813_v49 = vpop.f32.mrf.mxu0 }
 0x344   : > { %v1457_v5 = vmul.f32 0.01, %v1364_v48  ;;  %2934 = vmatmul.mubr.f32.gmra.mxu1 %v1487_v47 }
 0x345   : > { %v1368_v51 = vpop.f32.mrf.mxu0  ;;  %2936 = vmatprep.mubr.msk.f32.mxu1 %vm3545_vm0, %v3544_v0 }
 0x346   : > { %v1488_v52 = vmax.f32 %v1364_v48, %v1457_v5  ;;  %v1369_v53 = vadd.f32 %v4213_v33, %v1368_v51 }
 0x347   : > { %v2816_v54 = vpop.f32.mrf.mxu0 }
 0x348   : > { %v1458_v55 = vmul.f32 0.01, %v1369_v53  ;;  %2937 = vmatmul.mubr.f32.gmra.mxu1 %v1488_v52 }
 0x349   : > { %v1373_v56 = vpop.f32.mrf.mxu0  ;;  %2939 = vmatprep.mubr.msk.f32.mxu1 %vm3545_vm0, %v3544_v0 }
 0x34a   : > { %v1489_v57 = vmax.f32 %v1369_v53, %v1458_v55  ;;  %v1374_v58 = vadd.f32 %v4213_v33, %v1373_v56 }
 0x34b   : > { %v2819_v59 = vpop.f32.mrf.mxu0 }
 0x34c   : > { %v1459_v60 = vmul.f32 0.01, %v1374_v58  ;;  %2940 = vmatmul.mubr.f32.gmra.mxu1 %v1489_v57 }
 0x34d   : > { %v1378_v61 = vpop.f32.mrf.mxu0  ;;  %2942 = vmatprep.mubr.msk.f32.mxu1 %vm3545_vm0, %v3544_v0 }
 0x34e   : > { %v1490_v62 = vmax.f32 %v1374_v58, %v1459_v60  ;;  %v1379_v63 = vadd.f32 %v4213_v33, %v1378_v61 }
 0x34f   : > { %v2822_v1 = vpop.f32.mrf.mxu0 }
 0x350   : > { %v1460_v2 = vmul.f32 0.01, %v1379_v63  ;;  %2943 = vmatmul.mubr.f32.gmra.mxu1 %v1490_v62 }
 0x351   : > { %v1383_v3 = vpop.f32.mrf.mxu0  ;;  %2945 = vmatprep.mubr.msk.f32.mxu1 %vm3545_vm0, %v3544_v0 }
 0x352   : > { %v1491_v4 = vmax.f32 %v1379_v63, %v1460_v2  ;;  %v1384_v6 = vadd.f32 %v4213_v33, %v1383_v3  ;;  %v4309_v2 = vld [vmem:[%s4564_s8] ss:$0 sm:$0xff] }
 0x353   : > { %v2825_v7 = vpop.f32.mrf.mxu0 }
 0x354   : > { %v1461_v8 = vmul.f32 0.01, %v1384_v6  ;;  %2946 = vmatmul.mubr.f32.gmra.mxu1 %v1491_v4 }
 0x355   : > { %v1388_v9 = vpop.f32.mrf.mxu0  ;;  %2948 = vmatprep.mubr.msk.f32.mxu1 %vm3545_vm0, %v3544_v0 }
 0x356   : > { %v1492_v10 = vmax.f32 %v1384_v6, %v1461_v8  ;;  %v1389_v11 = vadd.f32 %v4213_v33, %v1388_v9 }
 0x357   : > { %v2828_v12 = vpop.f32.mrf.mxu0 }
 0x358   : > { %v1462_v13 = vmul.f32 0.01, %v1389_v11  ;;  %2949 = vmatmul.mubr.f32.gmra.mxu1 %v1492_v10 }
 0x359   : > { %v1393_v14 = vpop.f32.mrf.mxu0  ;;  %2951 = vmatprep.mubr.msk.f32.mxu1 %vm3545_vm0, %v3544_v0 }
 0x35a   : > { %v1493_v15 = vmax.f32 %v1389_v11, %v1462_v13  ;;  %v1394_v16 = vadd.f32 %v4213_v33, %v1393_v14 }
 0x35b   : > { %v2831_v17 = vpop.f32.mrf.mxu0 }
 0x35c   : > { %v1463_v18 = vmul.f32 0.01, %v1394_v16  ;;  %2952 = vmatmul.mubr.f32.gmra.mxu1 %v1493_v15 }
 0x35d   : > { %v1398_v19 = vpop.f32.mrf.mxu0  ;;  %2954 = vmatprep.mubr.msk.f32.mxu1 %vm3545_vm0, %v3544_v0 }
 0x35e   : > { %v1494_v20 = vmax.f32 %v1394_v16, %v1463_v18  ;;  %v1399_v21 = vadd.f32 %v4213_v33, %v1398_v19 }
 0x35f   : > { %v2834_v22 = vpop.f32.mrf.mxu0 }
 0x360   : > { %v1464_v23 = vmul.f32 0.01, %v1399_v21  ;;  %2955 = vmatmul.mubr.f32.gmra.mxu1 %v1494_v20 }
 0x361   : > { %v1403_v50 = vpop.f32.mrf.mxu0  ;;  %2957 = vmatprep.mubr.msk.f32.mxu1 %vm3545_vm0, %v3544_v0 }
 0x362   : > { %v1495_v24 = vmax.f32 %v1399_v21, %v1464_v23  ;;  %v1404_v25 = vadd.f32 %v4213_v33, %v1403_v50 }
 0x363   : > { %v2837_v26 = vpop.f32.mrf.mxu0 }
 0x364   : > { %v1465_v27 = vmul.f32 0.01, %v1404_v25  ;;  %2958 = vmatmul.mubr.f32.gmra.mxu1 %v1495_v24 }
 0x365   : > { %v1408_v28 = vpop.f32.mrf.mxu0  ;;  %2960 = vmatprep.mubr.msk.f32.mxu1 %vm3545_vm0, %v3544_v0 }
 0x366   : > { %v1496_v29 = vmax.f32 %v1404_v25, %v1465_v27  ;;  %v1409_v30 = vadd.f32 %v4213_v33, %v1408_v28 }
 0x367   : > { %v2840_v31 = vpop.f32.mrf.mxu0 }
 0x368   : > { %v1466_v32 = vmul.f32 0.01, %v1409_v30  ;;  %2961 = vmatmul.mubr.f32.gmra.mxu1 %v1496_v29 }
 0x369   : > { %v1413_v34 = vpop.f32.mrf.mxu0  ;;  %2963 = vmatprep.mubr.msk.f32.mxu1 %vm3545_vm0, %v3544_v0 }
 0x36a   : > { %v1497_v35 = vmax.f32 %v1409_v30, %v1466_v32  ;;  %v1414_v36 = vadd.f32 %v4213_v33, %v1413_v34 }
 0x36b   : > { %v2843_v37 = vpop.f32.mrf.mxu0 }
 0x36c   : > { %v1467_v38 = vmul.f32 0.01, %v1414_v36  ;;  %2964 = vmatmul.mubr.f32.gmra.mxu1 %v1497_v35 }
 0x36d   : > { %v1418_v39 = vpop.f32.mrf.mxu0  ;;  %2966 = vmatprep.mubr.msk.f32.mxu1 %vm3545_vm0, %v3544_v0 }
 0x36e   : > { %v1498_v40 = vmax.f32 %v1414_v36, %v1467_v38  ;;  %v1419_v41 = vadd.f32 %v4213_v33, %v1418_v39 }
 0x36f   : > { %v2846_v42 = vpop.f32.mrf.mxu0 }
 0x370   : > { %v1468_v43 = vmul.f32 0.01, %v1419_v41  ;;  %2967 = vmatmul.mubr.f32.gmra.mxu1 %v1498_v40 }
 0x371   : > { %v1423_v44 = vpop.f32.mrf.mxu0  ;;  %2969 = vmatprep.mubr.msk.f32.mxu1 %vm3545_vm0, %v3544_v0 }
 0x372   : > { %v1499_v45 = vmax.f32 %v1419_v41, %v1468_v43  ;;  %v1424_v46 = vadd.f32 %v4213_v33, %v1423_v44 }
 0x373   : > { %v2849_v47 = vpop.f32.mrf.mxu0 }
 0x374   : > { %v1469_v48 = vmul.f32 0.01, %v1424_v46  ;;  %2970 = vmatmul.mubr.f32.gmra.mxu1 %v1499_v45 }
 0x375   : > { %v1428_v49 = vpop.f32.mrf.mxu0  ;;  %2972 = vmatprep.mubr.msk.f32.mxu1 %vm3545_vm0, %v3544_v0 }
 0x376   : > { %v1500_v5 = vmax.f32 %v1424_v46, %v1469_v48  ;;  %v1429_v51 = vadd.f32 %v4213_v33, %v1428_v49 }
 0x377   : > { %v2852_v52 = vpop.f32.mrf.mxu0 }
 0x378   : > { %v1470_v53 = vmul.f32 0.01, %v1429_v51  ;;  %2973 = vmatmul.mubr.f32.gmra.mxu1 %v1500_v5 }
 0x379   : > { %v1433_v54 = vpop.f32.mrf.mxu0  ;;  %2975 = vmatprep.mubr.msk.f32.mxu1 %vm3545_vm0, %v3544_v0 }
 0x37a   : > { %v1501_v55 = vmax.f32 %v1429_v51, %v1470_v53  ;;  %v1434_v56 = vadd.f32 %v4213_v33, %v1433_v54 }
 0x37b   : > { %v2855_v57 = vpop.f32.mrf.mxu0 }
 0x37c   : > { %v1471_v58 = vmul.f32 0.01, %v1434_v56  ;;  %2976 = vmatmul.mubr.f32.gmra.mxu1 %v1501_v55 }
 0x37d   : > { %v1438_v59 = vpop.f32.mrf.mxu0  ;;  %2978 = vmatprep.mubr.msk.f32.mxu1 %vm3545_vm0, %v3544_v0 }
 0x37e   : > { %v1502_v60 = vmax.f32 %v1434_v56, %v1471_v58  ;;  %v1439_v61 = vadd.f32 %v4213_v33, %v1438_v59 }
 0x37f   : > { %v2858_v62 = vpop.f32.mrf.mxu0 }
 0x380   : > { %v1472_v63 = vmul.f32 0.01, %v1439_v61  ;;  %2979 = vmatmul.mubr.f32.gmra.mxu1 %v1502_v60 }
 0x381   : > { %2981 = vmatprep.mubr.msk.f32.mxu1 %vm3545_vm0, %v3544_v0 }
 0x382   : > { %v1503_v1 = vmax.f32 %v1439_v61, %v1472_v63 }
 0x384   : > { %2982 = vmatmul.mubr.f32.gmra.mxu1 %v1503_v1 }
 0x3cc   : > { %v1593_v3 = vpop.f32.mrf.mxu1 }
 0x3cd   : > { %v1594_v4 = vadd.f32 %v4309_v2, %v1593_v3 }
 0x3ce   : > { %v2893_v6 = vpop.f32.mrf.mxu1 }
 0x3cf   : > { %3201 = vtanh.f32 %v1594_v4 }
 0x3d0   : > { %v1598_v33 = vpop.f32.mrf.mxu1 }
 0x3d1   : > { %v1599_v7 = vadd.f32 %v4309_v2, %v1598_v33 }
 0x3d2   : > { %v2896_v8 = vpop.f32.mrf.mxu1 }
 0x3d3   : > { %3203 = vtanh.f32 %v1599_v7 }
 0x3d4   : > { %v1603_v9 = vpop.f32.mrf.mxu1 }
 0x3d5   : > { %v1604_v0 = vadd.f32 %v4309_v2, %v1603_v9 }
 0x3d6   : > { %v2899_v10 = vpop.f32.mrf.mxu1 }
 0x3d7   : > { %3205 = vtanh.f32 %v1604_v0 }
 0x3d8   : > { %v1608_v11 = vpop.f32.mrf.mxu1 }
 0x3d9   : > { %v1609_v12 = vadd.f32 %v4309_v2, %v1608_v11 }
 0x3da   : > { %v2902_v13 = vpop.f32.mrf.mxu1 }
 0x3db   : > { %3207 = vtanh.f32 %v1609_v12 }
 0x3dc   : > { %v3202_v14 = vpop.eup %3201  ;;  %v1613_v15 = vpop.f32.mrf.mxu1 }
 0x3dd   : > { %1778 = vst [vmem:[%s4316_s29] sm:$0xff] %v3202_v14  ;;  %v1614_v16 = vadd.f32 %v4309_v2, %v1613_v15 }
 0x3de   : > { %v2905_v17 = vpop.f32.mrf.mxu1 }
 0x3df   : > { %3209 = vtanh.f32 %v1614_v16 }
 0x3e0   : > { %v3204_v18 = vpop.eup %3203  ;;  %v1618_v19 = vpop.f32.mrf.mxu1 }
 0x3e1   : > { %1779 = vst [vmem:[%s4316_s29 + $0x8] sm:$0xff] %v3204_v18  ;;  %v1619_v20 = vadd.f32 %v4309_v2, %v1618_v19 }
 0x3e2   : > { %v2908_v21 = vpop.f32.mrf.mxu1 }
 0x3e3   : > { %3211 = vtanh.f32 %v1619_v20 }
 0x3e4   : > { %v3206_v22 = vpop.eup %3205  ;;  %v1623_v23 = vpop.f32.mrf.mxu1 }
 0x3e5   : > { %1780 = vst [vmem:[%s4316_s29 + $0x10] sm:$0xff] %v3206_v22  ;;  %v1624_v50 = vadd.f32 %v4309_v2, %v1623_v23 }
 0x3e6   : > { %v2911_v24 = vpop.f32.mrf.mxu1 }
 0x3e7   : > { %3213 = vtanh.f32 %v1624_v50 }
 0x3e8   : > { %v3208_v25 = vpop.eup %3207  ;;  %v1628_v26 = vpop.f32.mrf.mxu1 }
 0x3e9   : > { %1781 = vst [vmem:[%s4316_s29 + $0x18] sm:$0xff] %v3208_v25  ;;  %v1629_v27 = vadd.f32 %v4309_v2, %v1628_v26 }
 0x3ea   : > { %v2914_v28 = vpop.f32.mrf.mxu1 }
 0x3eb   : > { %3215 = vtanh.f32 %v1629_v27 }
 0x3ec   : > { %v3210_v29 = vpop.eup %3209  ;;  %v1633_v30 = vpop.f32.mrf.mxu1 }
 0x3ed   : > { %1782 = vst [vmem:[%s4316_s29 + $0x20] sm:$0xff] %v3210_v29  ;;  %v1634_v31 = vadd.f32 %v4309_v2, %v1633_v30 }
 0x3ee   : > { %v2917_v32 = vpop.f32.mrf.mxu1 }
 0x3ef   : > { %3217 = vtanh.f32 %v1634_v31 }
 0x3f0   : > { %v3212_v34 = vpop.eup %3211  ;;  %v1638_v35 = vpop.f32.mrf.mxu1 }
 0x3f1   : > { %1783 = vst [vmem:[%s4316_s29 + $0x28] sm:$0xff] %v3212_v34  ;;  %v1639_v36 = vadd.f32 %v4309_v2, %v1638_v35 }
 0x3f2   : > { %v2920_v37 = vpop.f32.mrf.mxu1 }
 0x3f3   : > { %3219 = vtanh.f32 %v1639_v36 }
 0x3f4   : > { %v3214_v38 = vpop.eup %3213  ;;  %v1643_v39 = vpop.f32.mrf.mxu1 }
 0x3f5   : > { %1784 = vst [vmem:[%s4316_s29 + $0x30] sm:$0xff] %v3214_v38  ;;  %v1644_v40 = vadd.f32 %v4309_v2, %v1643_v39 }
 0x3f6   : > { %v2923_v41 = vpop.f32.mrf.mxu1 }
 0x3f7   : > { %3221 = vtanh.f32 %v1644_v40 }
 0x3f8   : > { %v3216_v42 = vpop.eup %3215  ;;  %v1648_v43 = vpop.f32.mrf.mxu1 }
 0x3f9   : > { %1785 = vst [vmem:[%s4316_s29 + $0x38] sm:$0xff] %v3216_v42  ;;  %v1649_v44 = vadd.f32 %v4309_v2, %v1648_v43 }
 0x3fa   : > { %v2926_v45 = vpop.f32.mrf.mxu1 }
 0x3fb   : > { %3223 = vtanh.f32 %v1649_v44 }
 0x3fc   : > { %v3218_v46 = vpop.eup %3217  ;;  %v1653_v47 = vpop.f32.mrf.mxu1 }
 0x3fd   : > { %1786 = vst [vmem:[%s4316_s29 + $0x40] sm:$0xff] %v3218_v46  ;;  %v1654_v48 = vadd.f32 %v4309_v2, %v1653_v47 }
 0x3fe   : > { %v2929_v49 = vpop.f32.mrf.mxu1 }
 0x3ff   : > { %3225 = vtanh.f32 %v1654_v48 }
 0x400   : > { %v3220_v5 = vpop.eup %3219  ;;  %v1658_v51 = vpop.f32.mrf.mxu1 }
 0x401   : > { %1787 = vst [vmem:[%s4316_s29 + $0x48] sm:$0xff] %v3220_v5  ;;  %v1659_v52 = vadd.f32 %v4309_v2, %v1658_v51 }
 0x402   : > { %v2932_v53 = vpop.f32.mrf.mxu1 }
 0x403   : > { %3227 = vtanh.f32 %v1659_v52 }
 0x404   : > { %v3222_v54 = vpop.eup %3221  ;;  %v1663_v55 = vpop.f32.mrf.mxu1 }
 0x405   : > { %1788 = vst [vmem:[%s4316_s29 + $0x50] sm:$0xff] %v3222_v54  ;;  %v1664_v56 = vadd.f32 %v4309_v2, %v1663_v55 }
 0x406   : > { %v2935_v57 = vpop.f32.mrf.mxu1 }
 0x407   : > { %3229 = vtanh.f32 %v1664_v56 }
 0x408   : > { %v3224_v58 = vpop.eup %3223  ;;  %v1668_v59 = vpop.f32.mrf.mxu1 }
 0x409   : > { %1789 = vst [vmem:[%s4316_s29 + $0x58] sm:$0xff] %v3224_v58  ;;  %v1669_v60 = vadd.f32 %v4309_v2, %v1668_v59 }
 0x40a   : > { %v2938_v61 = vpop.f32.mrf.mxu1 }
 0x40b   : > { %3231 = vtanh.f32 %v1669_v60 }
 0x40c   : > { %v3226_v62 = vpop.eup %3225  ;;  %v1673_v63 = vpop.f32.mrf.mxu1 }
 0x40d   : > { %1790 = vst [vmem:[%s4316_s29 + $0x60] sm:$0xff] %v3226_v62  ;;  %v1674_v1 = vadd.f32 %v4309_v2, %v1673_v63 }
 0x40e   : > { %v2941_v3 = vpop.f32.mrf.mxu1 }
 0x40f   : > { %3233 = vtanh.f32 %v1674_v1 }
 0x410   : > { %v3228_v4 = vpop.eup %3227  ;;  %v1678_v6 = vpop.f32.mrf.mxu1 }
 0x411   : > { %1791 = vst [vmem:[%s4316_s29 + $0x68] sm:$0xff] %v3228_v4  ;;  %v1679_v33 = vadd.f32 %v4309_v2, %v1678_v6 }
 0x412   : > { %v2944_v7 = vpop.f32.mrf.mxu1 }
 0x413   : > { %3235 = vtanh.f32 %v1679_v33 }
 0x414   : > { %v3230_v8 = vpop.eup %3229  ;;  %v1683_v9 = vpop.f32.mrf.mxu1 }
 0x415   : > { %1792 = vst [vmem:[%s4316_s29 + $0x70] sm:$0xff] %v3230_v8  ;;  %v1684_v0 = vadd.f32 %v4309_v2, %v1683_v9 }
 0x416   : > { %v2947_v10 = vpop.f32.mrf.mxu1 }
 0x417   : > { %3237 = vtanh.f32 %v1684_v0 }
 0x418   : > { %v3232_v11 = vpop.eup %3231  ;;  %v1688_v12 = vpop.f32.mrf.mxu1 }
 0x419   : > { %1793 = vst [vmem:[%s4316_s29 + $0x78] sm:$0xff] %v3232_v11  ;;  %v1689_v13 = vadd.f32 %v4309_v2, %v1688_v12 }
 0x41a   : > { %v2950_v14 = vpop.f32.mrf.mxu1 }
 0x41b   : > { %3239 = vtanh.f32 %v1689_v13 }
 0x41c   : > { %v3234_v15 = vpop.eup %3233  ;;  %v1693_v16 = vpop.f32.mrf.mxu1 }
 0x41d   : > { %1794 = vst [vmem:[%s4316_s29 + $0x80] sm:$0xff] %v3234_v15  ;;  %v1694_v17 = vadd.f32 %v4309_v2, %v1693_v16 }
 0x41e   : > { %v2953_v18 = vpop.f32.mrf.mxu1 }
 0x41f   : > { %3241 = vtanh.f32 %v1694_v17 }
 0x420   : > { %v3236_v19 = vpop.eup %3235  ;;  %v1698_v20 = vpop.f32.mrf.mxu1 }
 0x421   : > { %1795 = vst [vmem:[%s4316_s29 + $0x88] sm:$0xff] %v3236_v19  ;;  %v1699_v21 = vadd.f32 %v4309_v2, %v1698_v20 }
 0x422   : > { %v2956_v22 = vpop.f32.mrf.mxu1 }
 0x423   : > { %3243 = vtanh.f32 %v1699_v21 }
 0x424   : > { %v3238_v23 = vpop.eup %3237  ;;  %v1703_v50 = vpop.f32.mrf.mxu1 }
 0x425   : > { %1796 = vst [vmem:[%s4316_s29 + $0x90] sm:$0xff] %v3238_v23  ;;  %v1704_v24 = vadd.f32 %v4309_v2, %v1703_v50 }
 0x426   : > { %v2959_v25 = vpop.f32.mrf.mxu1 }
 0x427   : > { %3245 = vtanh.f32 %v1704_v24 }
 0x428   : > { %v3240_v26 = vpop.eup %3239  ;;  %v1708_v27 = vpop.f32.mrf.mxu1 }
 0x429   : > { %1797 = vst [vmem:[%s4316_s29 + $0x98] sm:$0xff] %v3240_v26  ;;  %v1709_v28 = vadd.f32 %v4309_v2, %v1708_v27 }
 0x42a   : > { %v2962_v29 = vpop.f32.mrf.mxu1 }
 0x42b   : > { %3247 = vtanh.f32 %v1709_v28 }
 0x42c   : > { %v3242_v30 = vpop.eup %3241  ;;  %v1713_v31 = vpop.f32.mrf.mxu1 }
 0x42d   : > { %1798 = vst [vmem:[%s4316_s29 + $0xa0] sm:$0xff] %v3242_v30  ;;  %v1714_v32 = vadd.f32 %v4309_v2, %v1713_v31 }
 0x42e   : > { %v2965_v34 = vpop.f32.mrf.mxu1 }
 0x42f   : > { %3249 = vtanh.f32 %v1714_v32 }
 0x430   : > { %v3244_v35 = vpop.eup %3243  ;;  %v1718_v36 = vpop.f32.mrf.mxu1 }
 0x431   : > { %1799 = vst [vmem:[%s4316_s29 + $0xa8] sm:$0xff] %v3244_v35  ;;  %v1719_v37 = vadd.f32 %v4309_v2, %v1718_v36 }
 0x432   : > { %v2968_v38 = vpop.f32.mrf.mxu1 }
 0x433   : > { %3251 = vtanh.f32 %v1719_v37 }
 0x434   : > { %v3246_v39 = vpop.eup %3245  ;;  %v1723_v40 = vpop.f32.mrf.mxu1 }
 0x435   : > { %1800 = vst [vmem:[%s4316_s29 + $0xb0] sm:$0xff] %v3246_v39  ;;  %v1724_v41 = vadd.f32 %v4309_v2, %v1723_v40 }
 0x436   : > { %v2971_v42 = vpop.f32.mrf.mxu1 }
 0x437   : > { %3253 = vtanh.f32 %v1724_v41 }
 0x438   : > { %v3248_v43 = vpop.eup %3247  ;;  %v1728_v44 = vpop.f32.mrf.mxu1 }
 0x439   : > { %1801 = vst [vmem:[%s4316_s29 + $0xb8] sm:$0xff] %v3248_v43  ;;  %v1729_v45 = vadd.f32 %v4309_v2, %v1728_v44 }
 0x43a   : > { %v2974_v46 = vpop.f32.mrf.mxu1 }
 0x43b   : > { %3255 = vtanh.f32 %v1729_v45 }
 0x43c   : > { %v3250_v47 = vpop.eup %3249  ;;  %v1733_v48 = vpop.f32.mrf.mxu1 }
 0x43d   : > { %1802 = vst [vmem:[%s4316_s29 + $0xc0] sm:$0xff] %v3250_v47  ;;  %v1734_v49 = vadd.f32 %v4309_v2, %v1733_v48 }
 0x43e   : > { %v2977_v5 = vpop.f32.mrf.mxu1 }
 0x43f   : > { %3257 = vtanh.f32 %v1734_v49 }
 0x440   : > { %v3252_v51 = vpop.eup %3251  ;;  %v1738_v52 = vpop.f32.mrf.mxu1 }
 0x441   : > { %1803 = vst [vmem:[%s4316_s29 + $0xc8] sm:$0xff] %v3252_v51  ;;  %v1739_v53 = vadd.f32 %v4309_v2, %v1738_v52 }
 0x442   : > { %v2980_v54 = vpop.f32.mrf.mxu1 }
 0x443   : > { %3259 = vtanh.f32 %v1739_v53 }
 0x444   : > { %v3254_v55 = vpop.eup %3253  ;;  %v1743_v56 = vpop.f32.mrf.mxu1 }
 0x445   : > { %1804 = vst [vmem:[%s4316_s29 + $0xd0] sm:$0xff] %v3254_v55  ;;  %v1744_v57 = vadd.f32 %v4309_v2, %v1743_v56 }
 0x446   : > { %v2983_v58 = vpop.f32.mrf.mxu1 }
 0x447   : > { %3261 = vtanh.f32 %v1744_v57 }
 0x448   : > { %v3256_v59 = vpop.eup %3255 }
 0x449   : > { %1805 = vst [vmem:[%s4316_s29 + $0xd8] sm:$0xff] %v3256_v59 }
 0x44c   : > { %v3258_v60 = vpop.eup %3257 }
 0x44d   : > { %1806 = vst [vmem:[%s4316_s29 + $0xe0] sm:$0xff] %v3258_v60 }
 0x450   : > { %v3260_v61 = vpop.eup %3259 }
 0x451   : > { %1807 = vst [vmem:[%s4316_s29 + $0xe8] sm:$0xff] %v3260_v61  ;;  %1820 = sbr.rel (!%p4594_p6) target bundleno = 1172 (0x494), region = 80 }
 0x454   : > { %v3262_v62 = vpop.eup %3261 }
 0x455   : > { %1808 = vst [vmem:[%s4316_s29 + $0xf0] sm:$0xff] %v3262_v62 }
 0x456   : > { %s4613_s23 = smov (!%p1823_p12, %s1822_s23), 31 }
 0x457   : > { %s2276_s12 = sshll.u32 %s4613_s23, 7 }
 0x458   : > { %p2279_p9 = scmp.eq.s32.totalorder %s2276_s12, 0 }
 0x459   : > { %3263 = sdivrem.u32 (!%p2279_p9), %s4613_s23, 31 }
 0x45a   : > { %1831 = sbr.rel (%p2279_p9) target bundleno = 1172 (0x494), region = 84 }
 0x462   : > { %s4390_s18 = spop.drf %3263 }
 0x463   : > { %p2280_p8 = scmp.le.s32.totalorder %s4390_s18, 0 }
 0x464   : > { %s4595_s21 = smov (!%p2280_p8), %s4384_s30  ;;  %s4596_s26 = smov (!%p2280_p8), %s4052_s20 }
 0x465   : > { %2163 = sbr.rel (%p2280_p8) target bundleno = 1147 (0x47b), region = 183  ;;  %s4399_s28 = smov (!%p2280_p8), 0  }
 0x466   : > { %s4401_s22 = smov (!%p2280_p8), 0  }
 0x46a LB: >> { %v1956_v2 = vld [vmem:[%s3509_s26] sm:$0xff]  ;;  %v1958_v63 = vld [vmem:[%s3509_s26 + $0x8] sm:$0xff]  ;;  %v1960_v1 = vld [vmem:[%s3509_s26 + $0x10] sm:$0xff]  ;;  %s2018_s1 = sadd.s32 1, %s3513_s28  ;;  %s1950_s22 = sadd.s32 1, %s3517_s22   ;;  %s3517_s22 = sphi %s4401_s22, %s1950_s22   ;;  %s3513_s28 = sphi %s4399_s28, %s4599_s28   ;;  %s3509_s26 = sphi %s4596_s26, %s4598_s26   ;;  %s3505_s21 = sphi %s4595_s21, %s4597_s21  }
 0x46b   : >> { %1957 = vst [vmem:[%s3505_s21] sm:$0xff] %v1956_v2  ;;  %1959 = vst [vmem:[%s3505_s21 + $0x8] sm:$0xff] %v1958_v63  ;;  %v1962_v3 = vld [vmem:[%s3509_s26 + $0x18] sm:$0xff]  ;;  %v1964_v4 = vld [vmem:[%s3509_s26 + $0x20] sm:$0xff]  ;;  %p2019_p10 = scmp.ge.s32.totalorder %s2018_s1, %s4390_s18  ;;  %p1949_p1 = scmp.ge.s32.totalorder %s1950_s22, %s4390_s18 }
 0x46c   : >> { %1961 = vst [vmem:[%s3505_s21 + $0x10] sm:$0xff] %v1960_v1  ;;  %v1966_v6 = vld [vmem:[%s3509_s26 + $0x28] sm:$0xff]  ;;  %1963 = vst [vmem:[%s3505_s21 + $0x18] sm:$0xff] %v1962_v3  ;;  %v1968_v33 = vld [vmem:[%s3509_s26 + $0x30] sm:$0xff] }
 0x46d   : >> { %1965 = vst [vmem:[%s3505_s21 + $0x20] sm:$0xff] %v1964_v4  ;;  %1967 = vst [vmem:[%s3505_s21 + $0x28] sm:$0xff] %v1966_v6  ;;  %v1970_v7 = vld [vmem:[%s3509_s26 + $0x38] sm:$0xff]  ;;  %v1972_v8 = vld [vmem:[%s3509_s26 + $0x40] sm:$0xff]  ;;  %s4615_s1 = smov (%p2019_p10, %s2018_s1), 0 }
 0x46e   : >> { %1969 = vst [vmem:[%s3505_s21 + $0x30] sm:$0xff] %v1968_v33  ;;  %1971 = vst [vmem:[%s3505_s21 + $0x38] sm:$0xff] %v1970_v7  ;;  %v1974_v9 = vld [vmem:[%s3509_s26 + $0x48] sm:$0xff]  ;;  %v1976_v0 = vld [vmem:[%s3509_s26 + $0x50] sm:$0xff]  ;;  %s2021_s24 = smul.u32 248, %s4615_s1  ;;  %s4599_s28 = smov %s4615_s1 }
 0x46f   : >> { %1973 = vst [vmem:[%s3505_s21 + $0x40] sm:$0xff] %v1972_v8  ;;  %v1978_v10 = vld [vmem:[%s3509_s26 + $0x58] sm:$0xff]  ;;  %1975 = vst [vmem:[%s3505_s21 + $0x48] sm:$0xff] %v1974_v9  ;;  %v1980_v11 = vld [vmem:[%s3509_s26 + $0x60] sm:$0xff] }
 0x470   : >> { %1977 = vst [vmem:[%s3505_s21 + $0x50] sm:$0xff] %v1976_v0  ;;  %1979 = vst [vmem:[%s3505_s21 + $0x58] sm:$0xff] %v1978_v10  ;;  %v1982_v12 = vld [vmem:[%s3509_s26 + $0x68] sm:$0xff]  ;;  %v1984_v13 = vld [vmem:[%s3509_s26 + $0x70] sm:$0xff]  ;;  %s2023_s27 = scalar_lea.vmem %s4052_s20, %s2021_s24 [#allocation11]   ;;  %s2024_s12 = scalar_lea.vmem %s4384_s30, %s2021_s24  }
 0x471   : >> { %1981 = vst [vmem:[%s3505_s21 + $0x60] sm:$0xff] %v1980_v11  ;;  %1983 = vst [vmem:[%s3505_s21 + $0x68] sm:$0xff] %v1982_v12  ;;  %v1986_v14 = vld [vmem:[%s3509_s26 + $0x78] sm:$0xff]  ;;  %v1988_v15 = vld [vmem:[%s3509_s26 + $0x80] sm:$0xff] }
 0x472   : >> { %1985 = vst [vmem:[%s3505_s21 + $0x70] sm:$0xff] %v1984_v13  ;;  %v1990_v16 = vld [vmem:[%s3509_s26 + $0x88] sm:$0xff]  ;;  %1987 = vst [vmem:[%s3505_s21 + $0x78] sm:$0xff] %v1986_v14  ;;  %v1992_v17 = vld [vmem:[%s3509_s26 + $0x90] sm:$0xff] }
 0x473   : >> { %1989 = vst [vmem:[%s3505_s21 + $0x80] sm:$0xff] %v1988_v15  ;;  %1991 = vst [vmem:[%s3505_s21 + $0x88] sm:$0xff] %v1990_v16  ;;  %v1994_v18 = vld [vmem:[%s3509_s26 + $0x98] sm:$0xff]  ;;  %v1996_v19 = vld [vmem:[%s3509_s26 + $0xa0] sm:$0xff] }
 0x474   : >> { %1993 = vst [vmem:[%s3505_s21 + $0x90] sm:$0xff] %v1992_v17  ;;  %1995 = vst [vmem:[%s3505_s21 + $0x98] sm:$0xff] %v1994_v18  ;;  %v1998_v20 = vld [vmem:[%s3509_s26 + $0xa8] sm:$0xff]  ;;  %v2000_v21 = vld [vmem:[%s3509_s26 + $0xb0] sm:$0xff] }
 0x475   : >> { %1997 = vst [vmem:[%s3505_s21 + $0xa0] sm:$0xff] %v1996_v19  ;;  %v2002_v22 = vld [vmem:[%s3509_s26 + $0xb8] sm:$0xff]  ;;  %1999 = vst [vmem:[%s3505_s21 + $0xa8] sm:$0xff] %v1998_v20  ;;  %v2004_v23 = vld [vmem:[%s3509_s26 + $0xc0] sm:$0xff] }
 0x476   : >> { %2001 = vst [vmem:[%s3505_s21 + $0xb0] sm:$0xff] %v2000_v21  ;;  %2003 = vst [vmem:[%s3505_s21 + $0xb8] sm:$0xff] %v2002_v22  ;;  %v2006_v50 = vld [vmem:[%s3509_s26 + $0xc8] sm:$0xff]  ;;  %v2008_v24 = vld [vmem:[%s3509_s26 + $0xd0] sm:$0xff]  ;;  %1952 = sbr.rel (!%p1949_p1) target bundleno = 1130 (0x46a), region = 189 }
 0x477   : >> { %2005 = vst [vmem:[%s3505_s21 + $0xc0] sm:$0xff] %v2004_v23  ;;  %2007 = vst [vmem:[%s3505_s21 + $0xc8] sm:$0xff] %v2006_v50  ;;  %v2010_v25 = vld [vmem:[%s3509_s26 + $0xd8] sm:$0xff]  ;;  %v2012_v26 = vld [vmem:[%s3509_s26 + $0xe0] sm:$0xff] }
 0x478   : >> { %2009 = vst [vmem:[%s3505_s21 + $0xd0] sm:$0xff] %v2008_v24  ;;  %v2014_v27 = vld [vmem:[%s3509_s26 + $0xe8] sm:$0xff]  ;;  %2011 = vst [vmem:[%s3505_s21 + $0xd8] sm:$0xff] %v2010_v25  ;;  %v2016_v28 = vld [vmem:[%s3509_s26 + $0xf0] sm:$0xff]  ;;  %s4598_s26 = smov %s2023_s27 }
 0x479   : >> { %2013 = vst [vmem:[%s3505_s21 + $0xe0] sm:$0xff] %v2012_v26  ;;  %2015 = vst [vmem:[%s3505_s21 + $0xe8] sm:$0xff] %v2014_v27 }
 0x47a   : >> { %2017 = vst [vmem:[%s3505_s21 + $0xf0] sm:$0xff] %v2016_v28  ;;  %s4597_s21 = smov %s2024_s12 }
 0x47b PF: > { %3265 = sdivrem.u32 %s4613_s23, 31 }
 0x47c   : > { %s2281_s24 = smul.u32 248, %s4390_s18 }
 0x47e   : > { %s2029_s11 = scalar_lea.vmem %s4052_s20, %s2281_s24 [#allocation11]   ;;  %s2031_s0 = scalar_lea.vmem %s4384_s30, %s2281_s24  }
 0x484   : > { %s3266_s2 = spop.drf %3265 }
 0x485   : > { %p2283_p4 = scmp.le.s32.totalorder %s3266_s2, 0 }
 0x486   : > { %s3519_s12 = smov (!%p2283_p4), %s2031_s0   ;;  %s3523_s3 = smov (!%p2283_p4), %s2029_s11  }
 0x487   : > { %2177 = sbr.rel (%p2283_p4) target bundleno = 1172 (0x494), region = 194  ;;  %s3527_s27 = smov (!%p2283_p4), 0  }
 0x488   : > { %s3531_s4 = smov (!%p2283_p4), 0  }
 0x48c LB: >> { %v2041_v29 = vld [vmem:[%s3525_s3] sm:$0xff]  ;;  %s2043_s21 = sadd.s32 1, %s3529_s27  ;;  %s2035_s4 = sadd.s32 1, %s3533_s4   ;;  %s3533_s4 = sphi %s3531_s4, %s2035_s4   ;;  %s3529_s27 = sphi %s3527_s27, %s3528_s27   ;;  %s3525_s3 = sphi %s3523_s3, %s2048_s3   ;;  %s3521_s12 = sphi %s3519_s12, %s2049_s12  }
 0x48d   : >> { %2042 = vst [vmem:[%s3521_s12] sm:$0xff] %v2041_v29  ;;  %p2044_p2 = scmp.ge.s32.totalorder %s2043_s21, %s3266_s2  ;;  %p2034_p0 = scmp.ge.s32.totalorder %s2035_s4, %s3266_s2 }
 0x48f   : >> { %s4617_s21 = smov (%p2044_p2, %s2043_s21), 0  ;;  %2037 = sbr.rel (!%p2034_p0) target bundleno = 1164 (0x48c), region = 200 }
 0x490   : >> { %s2284_s20 = sshll.u32 %s4617_s21, 3  ;;  %s3528_s27 = smov %s4617_s21  }
 0x491   : >> { %s2048_s3 = scalar_lea.vmem %s2029_s11, %s2284_s20 [#allocation11]   ;;  %s2049_s12 = scalar_lea.vmem %s2031_s0, %s2284_s20  }
 0x494 PF: > { %p4600_p7 = scmp.ne.s32.totalorder %s4580_s25, 0 }
 0x495   : > { %s2056_s23 = smul.u32 (%p4600_p7), 31, %s3625_s17  ;;  %s4601_s3 = scalar_lea.sflag (%p4600_p7), [#allocation4], %s3769_s19 }
 0x496   : > { %2055 = sbr.rel (!%p4600_p7) target bundleno = 1207 (0x4b7), region = 132 }
 0x497   : > { %s2057_s30 = ssub.s32 (%p4600_p7), 63, %s2056_s23 }
 0x498   : > { %p2058_p11 = scmp.lt.s32.totalorder (%p4600_p7), %s2057_s30, 31 }
 0x49b   : > { %s4619_s30 = smov (!%p2058_p11, %s2057_s30), 31 }
 0x49c   : > { %s4499_s18 = sshll.u32 %s4619_s30, 7 }
 0x49d   : > { %s2062_s26 = ssub.s32 3968, %s4499_s18 }
 0x49e   : > { %2063 = vsyncadd %s4601_s3, %s2062_s26  ;;  %p2287_p13 = scmp.ne.s32.totalorder %s4499_s18, 0  ;;  %s2295_s0 = smul.u32 3968, %s3625_s17 }
 0x49f   : > { %s2068_s2 = sshll.u32 %s4316_s29, 4  ;;  %s3546_s22 = smov [#allocation12]   ;;  %s4512_s2 = int_to_ptr.vmem [resolvable:$true] %s2068_s2 }
 0x4a0   : > { %s4510_s11 = scalar_lea.hbm %s4566_s10, %s2295_s0  ;;  %s3397_s28 = scalar_lea.vmem %s4512_s2, %s4499_s18 }
 0x4a1   : > { %p3398_p5 = scmp.ne.s32.totalorder %s4512_s2, %s3397_s28  ;;  %s3401_s1 = sshll.u32 %s3546_s22, 4  ;;  %s3402_s1 = int_to_ptr.vmem [resolvable:$false] %s3401_s1 }
 0x4a2   : > { %s3403_s17 = scalar_lea.vmem %s3402_s1, 7936  ;;  %p3404_p12 = scmp.lt.s32.totalorder %s4512_s2, %s3402_s1 }
 0x4a3   : > { %p3399_p3 = pnand %p3398_p5, %p2287_p13  ;;  %p3405_p9 = scmp.lt.s32.totalorder %s3403_s17, %s3397_s28 }
 0x4a5   : > { %p3400_p6 = pneg %p3399_p3  ;;  %p3406_p8 = por %p3405_p9, %p3404_p12 }
 0x4a7   : > { %p3407_p10 = pnand %p3406_p8, %p3400_p6 }
 0x4a9   : > { %3410 = shalt.err (!%p3407_p10)
}
 0x4aa   : > { %s3411_s29 = scalar_lea.hbm %s4510_s11, %s4499_s18  ;;  %s3415_s27 = scalar_lea.hbm %s4566_s10, 8064 }
 0x4ab   : > { %p3412_p1 = scmp.ne.s32.totalorder %s4510_s11, %s3411_s29  ;;  %p3416_p0 = scmp.lt.s32.totalorder %s4510_s11, %s4566_s10 }
 0x4ac   : > { %p3417_p7 = scmp.lt.s32.totalorder %s3415_s27, %s3411_s29 }
 0x4ad   : > { %p3413_p4 = pnand %p3412_p1, %p2287_p13 }
 0x4ae   : > { %p3418_p11 = por %p3417_p7, %p3416_p0 }
 0x4af   : > { %p3414_p2 = pneg %p3413_p4 }
 0x4b1   : > { %p3419_p5 = pnand %p3418_p11, %p3414_p2 }
 0x4b3   : > { %3422 = shalt.err (!%p3419_p5)
}
 0x4b4   : > { %s3547_s23 = smov 128   ;;  %s3548_s30 = smov 8  }
 0x4b5   : > { %s4602_s26 = smov %s4601_s3 }
 0x4b6   : > { %2074 = dma.vmem_to_hbm [thread:$0]  (%p2287_p13), %s4512_s2, %s4499_s18, %s4510_s11, %s4602_s26, %s3547_s23, %s3547_s23, %s3548_s30  }
 0x4b7 PF: > { %s4603_s3 = sld [smem:[#allocation19_spill]]  ;;  %p3029_p3 = scmp.ge.s32.totalorder %s3501_s16, 2 }
 0x4b8   : > { %s2090_s0 = sand.u32 1, %s3489_s13  }
 0x4b9   : > { %s2091_s4 = scalar_lea.sflag [#allocation4], %s2090_s0 }
 0x4bd   : > { %p4604_p6 = scmp.ne.s32.totalorder %s4603_s3, 0 }
 0x4bf   : > { %p3018_p12 = pnand %p3029_p3, %p4604_p6 }
 0x4c1   : > { %p3019_p9 = pneg %p3018_p12 }
 0x4c3   : > { %3484 = dma.done.wait (%p3019_p9), %s2091_s4, 3968  }
 0x4c4   : > { %3486 = vsyncadd (%p3019_p9), %s2091_s4, 4294963328  ;;  %s4605_s16 = sld [smem:[#allocation17_spill]]  ;;  %s4607_s13 = smov %s3493_s14 }
 0x4c5   : > { %s4606_s25 = sld [smem:[#allocation18_spill]]  ;;  %s4608_s14 = smov %s3497_s15 }
 0x4ca   : > { %p26_p8 = scmp.ge.s32.totalorder %s4605_s16, 5  }
 0x4cb   : > { %s4609_s15 = smov %s4606_s25 }
 0x4cc   :  { %28 = sbr.rel (!%p26_p8) target bundleno = 13 (0xd), region = 211 }
 0x4d1   :  { %2096 = vsyncpa [#allocation3], 1 }
 0x4d2   :  { %2098 = vsyncpa [#allocation3 + $0x1], 1 }
 0x4d3   :  { %2099 = vsyncpa [#allocation6], 1 }
 0x4d4   :  { %2100 = vsyncpa [#allocation9], 1 }
 0x4d5   :  { %2101 = vsyncpa [#allocation4], 1 }
 0x4d6   :  { %2103 = vsyncpa [#allocation4 + $0x1], 1 }

</bundles_post_ra>
